<compile_context>
chip_gen: v7x
topology: tpu7x:2x2x1
jax: 0.10.0
libtpu: 0.0.40
codegen_flags: <defaults>
</compile_context>

<pallas_src>
import math
import functools

import jax
import jax.numpy as jnp
from jax import lax
from jax.experimental import pallas as pl
from jax.experimental.pallas import tpu as pltpu


# ----------------------------------------------------------------------------
# Small helpers
# ----------------------------------------------------------------------------
def _round_up(x, m):
    return (x + m - 1) // m * m


def _layernorm(x, w, b, eps=1e-5):
    # x: (N, D) f32, w/b: (1, D) f32
    mu = jnp.mean(x, axis=-1, keepdims=True)
    var = jnp.mean((x - mu) ** 2, axis=-1, keepdims=True)
    return (x - mu) * lax.rsqrt(var + eps) * w + b


def _gelu_tanh(x):
    # TODO(synk): tanh-approx GELU used instead of exact erf-GELU (erf lowering
    # in Mosaic is not guaranteed); relative difference < 1e-3.
    c = math.sqrt(2.0 / math.pi)
    return 0.5 * x * (1.0 + jnp.tanh(c * (x + 0.044715 * x * x * x)))


def _vmem_limit_bytes():
    # Generation-aware VMEM budget: stay well below physical capacity
    # (v7x: 64 MiB -> ~48 MiB, v5e/v6e: 128 MiB -> 112 MiB). Conservative
    # fallback if the query is unavailable.
    try:
        cap = int(pltpu.get_tpu_info().vmem_capacity_bytes)
        return int(max(min(cap - 16 * 2**20, 112 * 2**20), 32 * 2**20))
    except Exception:
        return 48 * 2**20


# ----------------------------------------------------------------------------
# Fully-fused ViT kernel.  grid = (num_batch_blocks, depth)
#   - activation (Bt, Npad, D) resident in VMEM scratch across the layer axis
#   - per-layer weights streamed (double-buffered) from stacked (L, ...) arrays
#   - l == 0       : patch-embedding matmul + CLS / pos_embed assembly
#   - l == depth-1 : final LN -> pre_logits -> head on the CLS rows only
# ----------------------------------------------------------------------------
def vit_kernel(
    patches_ref, pw_ref, poscls_ref,
    ln1w, ln1b, qkvw, qkvb, projw, projb,
    ln2w, ln2b, fc1w, fc1b, fc2w, fc2b,
    normw, normb, prew, preb, hdw, hdb,
    o_ref,
    x_scr,
    *, num_heads, scale, n_real, depth,
):
    l = pl.program_id(1)
    Bt, Npad, D = x_scr.shape
    hd = D // num_heads
    M = Bt * Npad
    G = Bt * num_heads

    # ---- layer 0: fused patch embedding + CLS / pos_embed assembly --------
    @pl.when(l == 0)
    def _():
        PD = patches_ref.shape[-1]
        pt = patches_ref[...].reshape(M, PD)                    # bf16
        tok = jnp.dot(pt, pw_ref[...], preferred_element_type=jnp.float32)
        # poscls rows: 0 -> cls + pos[0]; 1..N-1 -> pos + conv bias; pad -> 0.
        # patch rows were pre-positioned so row 0 and the pad rows are zero.
        x_scr[...] = tok.reshape(Bt, Npad, D) + poscls_ref[...]

    x2 = x_scr[...].reshape(M, D)                               # f32 residual

    # ---------------- multi-head self-attention (pre-LN) -------------------
    h = _layernorm(x2, ln1w[0], ln1b[0]).astype(jnp.bfloat16)
    qkv = (jnp.dot(h, qkvw[0], preferred_element_type=jnp.float32)
           + qkvb[0]).astype(jnp.bfloat16)                      # (M, 3D)

    def heads(c):                      # component c in {q,k,v} -> (H*Bt, Npad, hd)
        cols = [
            qkv[:, c * D + i * hd:c * D + (i + 1) * hd].reshape(Bt, Npad, hd)
            for i in range(num_heads)
        ]
        # TODO(synk): a single einshape-style lane regroup would avoid the
        # per-head slices; slice+stack kept for lowering robustness.
        return jnp.stack(cols, axis=0).reshape(G, Npad, hd)

    q3, k3, v3 = heads(0), heads(1), heads(2)

    # batched over (head, sample): one MXU job per contraction
    s = jnp.einsum("gqd,gkd->gqk", q3, k3,
                   preferred_element_type=jnp.float32) * scale
    col = lax.broadcasted_iota(jnp.int32, (1, 1, Npad), 2)
    s = jnp.where(col < n_real, s, -1e30)                       # mask padded keys
    s = s - jnp.max(s, axis=-1, keepdims=True)
    e = jnp.exp(s)
    p = e * pl.reciprocal(jnp.sum(e, axis=-1, keepdims=True), approx=True)

    attn = jnp.einsum("gqk,gkd->gqd", p.astype(jnp.bfloat16), v3,
                      preferred_element_type=jnp.float32)       # (G, Npad, hd)
    # concat heads on lanes -> single full-depth (M, D) @ (D, D) projection
    cat = jnp.concatenate(
        [attn[i * Bt:(i + 1) * Bt] for i in range(num_heads)], axis=-1)
    cat = cat.reshape(M, D).astype(jnp.bfloat16)
    x2 = x2 + (jnp.dot(cat, projw[0], preferred_element_type=jnp.float32)
               + projb[0])

    # ------------------------------ MLP (pre-LN) ---------------------------
    # TODO(synk): for ViT-L-class Hm on v7x, tile fc1/fc2 streaming over the
    # hidden dim (extra inner grid axis) so the double-buffered slab fits VMEM.
    hm = _layernorm(x2, ln2w[0], ln2b[0]).astype(jnp.bfloat16)
    hm = jnp.dot(hm, fc1w[0], preferred_element_type=jnp.float32) + fc1b[0]
    hm = _gelu_tanh(hm).astype(jnp.bfloat16)
    x2 = x2 + (jnp.dot(hm, fc2w[0], preferred_element_type=jnp.float32)
               + fc2b[0])

    x_scr[...] = x2.reshape(Bt, Npad, D)

    # ---- last layer: final LN -> pre_logits (tanh) -> head on CLS rows ----
    @pl.when(l == depth - 1)
    def _():
        cls = x2.reshape(Bt, Npad, D)[:, 0, :]                  # (Bt, D)
        g = _layernorm(cls, normw[...], normb[...])
        g = jnp.tanh(jnp.dot(g.astype(jnp.bfloat16), prew[...],
                             preferred_element_type=jnp.float32) + preb[...])
        o_ref[0] = (jnp.dot(g.astype(jnp.bfloat16), hdw[...],
                            preferred_element_type=jnp.float32) + hdb[...])


# ----------------------------------------------------------------------------
# Glue: patch extraction (== stride-p conv unfold) and the fused forward call
# ----------------------------------------------------------------------------
def extract_patches(x, p):
    # (B, C, H, W) NCHW -> (B, Np, C*p*p); inner order matches a Conv2d weight
    # of shape (D, C, p, p) reshaped to (D, C*p*p).
    B, C, H, W = x.shape
    gh, gw = H // p, W // p
    x = x.reshape(B, C, gh, p, gw, p)
    x = x.transpose(0, 2, 4, 1, 3, 5)
    return x.reshape(B, gh * gw, C * p * p)


def vit_forward(x, params, cfg):
    p = cfg["patch_size"]
    D = cfg["embed_dim"]
    depth = cfg["depth"]
    NC = cfg["num_classes"]
    B = x.shape[0]

    patches = extract_patches(x, p)                       # (B, Np, PD) f32
    Np, PD = patches.shape[1], patches.shape[2]
    n_real = Np + 1
    Npad = _round_up(n_real, 16)                          # bf16 sublane tile

    # place patch rows at 1..Np (row 0 = CLS slot, tail = pad), cast to bf16
    patches = jnp.pad(patches, ((0, 0), (1, Npad - n_real), (0, 0)))
    patches = patches.astype(jnp.bfloat16)

    # Batch blocking: amortize per-layer weight streaming over Bt samples while
    # keeping >= 2 parallel grid steps (v7x dual-TC / megacore sharding).
    Bt = cfg.get("batch_block") or max(1, min(8, B // 2))
    Bpad = _round_up(B, Bt)
    if Bpad != B:
        patches = jnp.pad(patches, ((0, Bpad - B), (0, 0), (0, 0)))
    nb = Bpad // Bt

    # poscls: row 0 = cls_token + pos[0]; rows 1..N-1 = pos + conv bias; pad = 0
    pos = params["pos_embed"][0]                          # (n_real, D)
    poscls = jnp.concatenate(
        [pos[0:1] + params["cls_token"][0],
         pos[1:] + params["patch_b"],
         jnp.zeros((Npad - n_real, D), jnp.float32)], axis=0)[None]  # (1,Npad,D)

    bp = params["blocks"]

    def wspec(arr):                   # stacked (L, ...) -> one layer per step
        nd = arr.ndim
        return pl.BlockSpec((1,) + arr.shape[1:],
                            lambda b, l: (l,) + (0,) * (nd - 1))

    def cspec(arr):                   # constant weight, fetched once
        nd = arr.ndim
        return pl.BlockSpec(arr.shape, lambda b, l: (0,) * nd)

    kern = functools.partial(
        vit_kernel, num_heads=cfg["num_heads"], scale=cfg["scale"],
        n_real=n_real, depth=depth)

    out = pl.pallas_call(
        kern,
        out_shape=jax.ShapeDtypeStruct((nb, Bt, NC), jnp.float32),
        grid=(nb, depth),
        in_specs=[
            pl.BlockSpec((Bt, Npad, PD), lambda b, l: (b, 0, 0)),
            cspec(params["patch_w"]),
            cspec(poscls),
            wspec(bp["ln1_w"]), wspec(bp["ln1_b"]),
            wspec(bp["qkv_w"]), wspec(bp["qkv_b"]),
            wspec(bp["proj_w"]), wspec(bp["proj_b"]),
            wspec(bp["ln2_w"]), wspec(bp["ln2_b"]),
            wspec(bp["fc1_w"]), wspec(bp["fc1_b"]),
            wspec(bp["fc2_w"]), wspec(bp["fc2_b"]),
            cspec(params["norm_w"]), cspec(params["norm_b"]),
            cspec(params["pre_w"]), cspec(params["pre_b"]),
            cspec(params["head_w"]), cspec(params["head_b"]),
        ],
        out_specs=pl.BlockSpec((1, Bt, NC), lambda b, l: (b, 0, 0)),
        scratch_shapes=[pltpu.VMEM((Bt, Npad, D), jnp.float32)],
        compiler_params=pltpu.CompilerParams(
            dimension_semantics=("parallel", "arbitrary"),
            vmem_limit_bytes=_vmem_limit_bytes(),
        ),
    )(
        patches, params["patch_w"], poscls,
        bp["ln1_w"], bp["ln1_b"], bp["qkv_w"], bp["qkv_b"],
        bp["proj_w"], bp["proj_b"], bp["ln2_w"], bp["ln2_b"],
        bp["fc1_w"], bp["fc1_b"], bp["fc2_w"], bp["fc2_b"],
        params["norm_w"], params["norm_b"],
        params["pre_w"], params["pre_b"],
        params["head_w"], params["head_b"],
    )
    return out.reshape(Bpad, NC)[:B]


# ----------------------------------------------------------------------------
# Deterministic parameter init (kaiming-uniform weights, as in init_weights)
# Matmul weights stored in bf16 (streamed to the MXU), biases / LN in f32.
# ----------------------------------------------------------------------------
def _kaiming_uniform(key, shape, fan_in):
    bound = math.sqrt(6.0 / fan_in)
    return jax.random.uniform(key, shape, jnp.float32, -bound, bound)


def init_params(key, cfg):
    D = cfg["embed_dim"]
    C = cfg["in_channels"]
    p = cfg["patch_size"]
    Np = (cfg["img_size"] // p) ** 2
    N = Np + 1
    Hm = int(D * cfg["mlp_ratio"])
    NC = cfg["num_classes"]
    PD = C * p * p
    L = cfg["depth"]
    bf = jnp.bfloat16

    keys = iter(jax.random.split(key, 8 + 6 * L))
    params = {
        # conv weight stored pre-reshaped/transposed to (C*p*p, D)
        "patch_w": _kaiming_uniform(next(keys), (PD, D), PD).astype(bf),
        "patch_b": jnp.zeros((1, D), jnp.float32),
        "cls_token": 0.02 * jax.random.normal(next(keys), (1, 1, D), jnp.float32),
        "pos_embed": 0.02 * jax.random.normal(next(keys), (1, N, D), jnp.float32),
        "norm_w": jnp.ones((1, D), jnp.float32),
        "norm_b": jnp.zeros((1, D), jnp.float32),
        "pre_w": _kaiming_uniform(next(keys), (D, D), D).astype(bf),
        "pre_b": jnp.zeros((1, D), jnp.float32),
        "head_w": _kaiming_uniform(next(keys), (D, NC), D).astype(bf),
        "head_b": jnp.zeros((1, NC), jnp.float32),
    }

    # stacked per-layer block weights, leading dim = layer
    params["blocks"] = {
        "ln1_w": jnp.ones((L, 1, D), jnp.float32),
        "ln1_b": jnp.zeros((L, 1, D), jnp.float32),
        "qkv_w": jnp.stack([_kaiming_uniform(next(keys), (D, 3 * D), D)
                            for _ in range(L)]).astype(bf),
        "qkv_b": (jnp.stack([_kaiming_uniform(next(keys), (1, 3 * D), D)
                             for _ in range(L)])
                  if cfg["qkv_bias"]
                  else jnp.zeros((L, 1, 3 * D), jnp.float32)),
        # proj weight kept as (L, D, D): input dim = concat of heads
        "proj_w": jnp.stack([_kaiming_uniform(next(keys), (D, D), D)
                             for _ in range(L)]).astype(bf),
        "proj_b": jnp.zeros((L, 1, D), jnp.float32),
        "ln2_w": jnp.ones((L, 1, D), jnp.float32),
        "ln2_b": jnp.zeros((L, 1, D), jnp.float32),
        "fc1_w": jnp.stack([_kaiming_uniform(next(keys), (D, Hm), D)
                            for _ in range(L)]).astype(bf),
        "fc1_b": jnp.zeros((L, 1, Hm), jnp.float32),
        "fc2_w": jnp.stack([_kaiming_uniform(next(keys), (Hm, D), Hm)
                            for _ in range(L)]).astype(bf),
        "fc2_b": jnp.zeros((L, 1, D), jnp.float32),
    }
    return params


# ----------------------------------------------------------------------------
if __name__ == "__main__":
    cfg = dict(
        img_size=16,
        patch_size=4,
        in_channels=4,
        num_classes=10,
        embed_dim=32,
        depth=2,
        num_heads=4,
        qkv_bias=True,
        mlp_ratio=4.0,
    )
    head_dim = cfg["embed_dim"] // cfg["num_heads"]
    cfg["scale"] = head_dim ** -0.5            # qkv_scale=None -> default scale

    key = jax.random.PRNGKey(0)
    k_param, k_x = jax.random.split(key)
    params = init_params(k_param, cfg)

    x = jax.random.normal(
        k_x, (2, cfg["in_channels"], cfg["img_size"], cfg["img_size"]),
        jnp.float32)   # NCHW, matching the PyTorch module input

    out = vit_forward(x, params, cfg)
    out = jax.block_until_ready(out)
    assert out.shape == (2, cfg["num_classes"]), out.shape
    assert jnp.all(jnp.isfinite(out))
    print("KERNEL_OK")
</pallas_src>

<mosaic_0001>
module attributes {stable_mosaic.version = 11 : i64} {
  func.func @vit_kernel(%arg0: i32, %arg1: i32, %arg2: memref<1x32x64xbf16, #tpu.memory_space<vmem>>, %arg3: memref<64x32xbf16, #tpu.memory_space<vmem>>, %arg4: memref<1x32x32xf32, #tpu.memory_space<vmem>>, %arg5: memref<1x1x32xf32, #tpu.memory_space<vmem>>, %arg6: memref<1x1x32xf32, #tpu.memory_space<vmem>>, %arg7: memref<1x32x96xbf16, #tpu.memory_space<vmem>>, %arg8: memref<1x1x96xf32, #tpu.memory_space<vmem>>, %arg9: memref<1x32x32xbf16, #tpu.memory_space<vmem>>, %arg10: memref<1x1x32xf32, #tpu.memory_space<vmem>>, %arg11: memref<1x1x32xf32, #tpu.memory_space<vmem>>, %arg12: memref<1x1x32xf32, #tpu.memory_space<vmem>>, %arg13: memref<1x32x128xbf16, #tpu.memory_space<vmem>>, %arg14: memref<1x1x128xf32, #tpu.memory_space<vmem>>, %arg15: memref<1x128x32xbf16, #tpu.memory_space<vmem>>, %arg16: memref<1x1x32xf32, #tpu.memory_space<vmem>>, %arg17: memref<1x32xf32, #tpu.memory_space<vmem>>, %arg18: memref<1x32xf32, #tpu.memory_space<vmem>>, %arg19: memref<32x32xbf16, #tpu.memory_space<vmem>>, %arg20: memref<1x32xf32, #tpu.memory_space<vmem>>, %arg21: memref<32x10xbf16, #tpu.memory_space<vmem>>, %arg22: memref<1x10xf32, #tpu.memory_space<vmem>>, %arg23: memref<1x1x10xf32, #tpu.memory_space<vmem>>, %arg24: memref<1x32x32xf32, #tpu.memory_space<vmem>>) attributes {dimension_semantics = [#tpu.dimension_semantics<parallel>, #tpu.dimension_semantics<arbitrary>], iteration_bounds = array<i64: 2, 2>, scalar_prefetch = 0 : i64, scratch_operands = 1 : i64, tpu.core_type = #tpu.core_type<tc>, window_params = [{transform_indices = @transform_0, window_bounds = array<i64: 1, 32, 64>}, {pipeline_mode = #tpu.pipeline_mode<synchronous>, transform_indices = @transform_1, window_bounds = array<i64: 64, 32>}, {pipeline_mode = #tpu.pipeline_mode<synchronous>, transform_indices = @transform_2, window_bounds = array<i64: 1, 32, 32>}, {transform_indices = @transform_3, window_bounds = array<i64: 1, 1, 32>}, {transform_indices = @transform_4, window_bounds = array<i64: 1, 1, 32>}, {transform_indices = @transform_5, window_bounds = array<i64: 1, 32, 96>}, {transform_indices = @transform_6, window_bounds = array<i64: 1, 1, 96>}, {transform_indices = @transform_7, window_bounds = array<i64: 1, 32, 32>}, {transform_indices = @transform_8, window_bounds = array<i64: 1, 1, 32>}, {transform_indices = @transform_9, window_bounds = array<i64: 1, 1, 32>}, {transform_indices = @transform_10, window_bounds = array<i64: 1, 1, 32>}, {transform_indices = @transform_11, window_bounds = array<i64: 1, 32, 128>}, {transform_indices = @transform_12, window_bounds = array<i64: 1, 1, 128>}, {transform_indices = @transform_13, window_bounds = array<i64: 1, 128, 32>}, {transform_indices = @transform_14, window_bounds = array<i64: 1, 1, 32>}, {pipeline_mode = #tpu.pipeline_mode<synchronous>, transform_indices = @transform_15, window_bounds = array<i64: 1, 32>}, {pipeline_mode = #tpu.pipeline_mode<synchronous>, transform_indices = @transform_16, window_bounds = array<i64: 1, 32>}, {pipeline_mode = #tpu.pipeline_mode<synchronous>, transform_indices = @transform_17, window_bounds = array<i64: 32, 32>}, {pipeline_mode = #tpu.pipeline_mode<synchronous>, transform_indices = @transform_18, window_bounds = array<i64: 1, 32>}, {pipeline_mode = #tpu.pipeline_mode<synchronous>, transform_indices = @transform_19, window_bounds = array<i64: 32, 10>}, {pipeline_mode = #tpu.pipeline_mode<synchronous>, transform_indices = @transform_20, window_bounds = array<i64: 1, 10>}, {transform_indices = @transform_21, window_bounds = array<i64: 1, 1, 10>}]} {
    %c0_i32 = arith.constant 0 : i32
    %0 = arith.cmpi eq, %arg1, %c0_i32 : i32
    %1 = arith.extui %0 : i1 to i32
    %c0_i32_0 = arith.constant 0 : i32
    %2 = arith.cmpi ne, %1, %c0_i32_0 : i32
    scf.if %2 {
      %c0_66 = arith.constant 0 : index
      %c0_67 = arith.constant 0 : index
      %c0_68 = arith.constant 0 : index
      %180 = vector.load %arg2[%c0_66, %c0_67, %c0_68] : memref<1x32x64xbf16, #tpu.memory_space<vmem>>, vector<1x32x64xbf16>
      %181 = vector.shape_cast %180 : vector<1x32x64xbf16> to vector<32x64xbf16>
      %c0_69 = arith.constant 0 : index
      %c0_70 = arith.constant 0 : index
      %182 = vector.load %arg3[%c0_69, %c0_70] : memref<64x32xbf16, #tpu.memory_space<vmem>>, vector<64x32xbf16>
      %cst_71 = arith.constant dense<0.000000e+00> : vector<32x32xf32>
      %183 = tpu.matmul %181, %182, %cst_71 {dimension_numbers = #tpu.dot_dimension_numbers<[1], [0], [0], [1], [0, 0, 1, 1], [], []>} : vector<32x64xbf16>, vector<64x32xbf16>, vector<32x32xf32> -> vector<32x32xf32>
      %184 = vector.shape_cast %183 : vector<32x32xf32> to vector<1x32x32xf32>
      %c0_72 = arith.constant 0 : index
      %c0_73 = arith.constant 0 : index
      %c0_74 = arith.constant 0 : index
      %185 = vector.load %arg4[%c0_72, %c0_73, %c0_74] : memref<1x32x32xf32, #tpu.memory_space<vmem>>, vector<1x32x32xf32>
      %186 = arith.addf %184, %185 : vector<1x32x32xf32>
      %c0_75 = arith.constant 0 : index
      %c0_76 = arith.constant 0 : index
      %c0_77 = arith.constant 0 : index
      %187 = vector.load %arg24[%c0_75, %c0_76, %c0_77] : memref<1x32x32xf32, #tpu.memory_space<vmem>>, vector<1x32x32xf32>
      tpu.vector_store %arg24[%c0_75, %c0_76, %c0_77], %186 {strides = array<i32>} : memref<1x32x32xf32, #tpu.memory_space<vmem>>, vector<1x32x32xf32>,
    } else {
    }
    %c0 = arith.constant 0 : index
    %c0_1 = arith.constant 0 : index
    %c0_2 = arith.constant 0 : index
    %3 = vector.load %arg24[%c0, %c0_1, %c0_2] : memref<1x32x32xf32, #tpu.memory_space<vmem>>, vector<1x32x32xf32>
    %4 = vector.shape_cast %3 : vector<1x32x32xf32> to vector<32x32xf32>
    %c0_3 = arith.constant 0 : index
    %c0_4 = arith.constant 0 : index
    %c0_5 = arith.constant 0 : index
    %5 = vector.load %arg5[%c0_3, %c0_4, %c0_5] : memref<1x1x32xf32, #tpu.memory_space<vmem>>, vector<1x1x32xf32>
    %6 = vector.shape_cast %5 : vector<1x1x32xf32> to vector<1x32xf32>
    %c0_6 = arith.constant 0 : index
    %c0_7 = arith.constant 0 : index
    %c0_8 = arith.constant 0 : index
    %7 = vector.load %arg6[%c0_6, %c0_7, %c0_8] : memref<1x1x32xf32, #tpu.memory_space<vmem>>, vector<1x1x32xf32>
    %8 = vector.shape_cast %7 : vector<1x1x32xf32> to vector<1x32xf32>
    %cst = arith.constant dense<0.000000e+00> : vector<32xf32>
    %9 = vector.multi_reduction <add>, %4, %cst [1] : vector<32x32xf32> to vector<32xf32>
    %10 = vector.shape_cast %9 : vector<32xf32> to vector<32x1xf32>
    %cst_9 = arith.constant 3.200000e+01 : f32
    %11 = vector.broadcast %cst_9 : f32 to vector<32x1xf32>
    %12 = arith.divf %10, %11 : vector<32x1xf32>
    %13 = vector.broadcast %12 : vector<32x1xf32> to vector<32x32xf32>
    %14 = arith.subf %4, %13 : vector<32x32xf32>
    %15 = arith.mulf %14, %14 : vector<32x32xf32>
    %cst_10 = arith.constant dense<0.000000e+00> : vector<32xf32>
    %16 = vector.multi_reduction <add>, %15, %cst_10 [1] : vector<32x32xf32> to vector<32xf32>
    %17 = vector.shape_cast %16 : vector<32xf32> to vector<32x1xf32>
    %cst_11 = arith.constant 3.200000e+01 : f32
    %18 = vector.broadcast %cst_11 : f32 to vector<32x1xf32>
    %19 = arith.divf %17, %18 : vector<32x1xf32>
    %20 = vector.broadcast %12 : vector<32x1xf32> to vector<32x32xf32>
    %21 = arith.subf %4, %20 : vector<32x32xf32>
    %cst_12 = arith.constant 9.99999974E-6 : f32
    %22 = vector.broadcast %cst_12 : f32 to vector<32x1xf32>
    %23 = arith.addf %19, %22 : vector<32x1xf32>
    %24 = math.rsqrt %23 : vector<32x1xf32>
    %25 = vector.broadcast %24 : vector<32x1xf32> to vector<32x32xf32>
    %26 = arith.mulf %21, %25 : vector<32x32xf32>
    %27 = vector.broadcast %6 : vector<1x32xf32> to vector<32x32xf32>
    %28 = arith.mulf %26, %27 : vector<32x32xf32>
    %29 = vector.broadcast %8 : vector<1x32xf32> to vector<32x32xf32>
    %30 = arith.addf %28, %29 : vector<32x32xf32>
    %31 = arith.truncf %30 : vector<32x32xf32> to vector<32x32xbf16>
    %c0_13 = arith.constant 0 : index
    %c0_14 = arith.constant 0 : index
    %c0_15 = arith.constant 0 : index
    %32 = vector.load %arg7[%c0_13, %c0_14, %c0_15] : memref<1x32x96xbf16, #tpu.memory_space<vmem>>, vector<1x32x96xbf16>
    %33 = vector.shape_cast %32 : vector<1x32x96xbf16> to vector<32x96xbf16>
    %cst_16 = arith.constant dense<0.000000e+00> : vector<32x96xf32>
    %34 = tpu.matmul %31, %33, %cst_16 {dimension_numbers = #tpu.dot_dimension_numbers<[1], [0], [0], [1], [0, 0, 1, 1], [], []>} : vector<32x32xbf16>, vector<32x96xbf16>, vector<32x96xf32> -> vector<32x96xf32>
    %c0_17 = arith.constant 0 : index
    %c0_18 = arith.constant 0 : index
    %c0_19 = arith.constant 0 : index
    %35 = vector.load %arg8[%c0_17, %c0_18, %c0_19] : memref<1x1x96xf32, #tpu.memory_space<vmem>>, vector<1x1x96xf32>
    %36 = vector.shape_cast %35 : vector<1x1x96xf32> to vector<1x96xf32>
    %37 = vector.broadcast %36 : vector<1x96xf32> to vector<32x96xf32>
    %38 = arith.addf %34, %37 : vector<32x96xf32>
    %39 = arith.truncf %38 : vector<32x96xf32> to vector<32x96xbf16>
    %40 = vector.extract_strided_slice %39 {offsets = [0, 0], sizes = [32, 8], strides = [1, 1]} : vector<32x96xbf16> to vector<32x8xbf16>
    %41 = vector.shape_cast %40 : vector<32x8xbf16> to vector<1x32x8xbf16>
    %42 = vector.extract_strided_slice %39 {offsets = [0, 8], sizes = [32, 8], strides = [1, 1]} : vector<32x96xbf16> to vector<32x8xbf16>
    %43 = vector.shape_cast %42 : vector<32x8xbf16> to vector<1x32x8xbf16>
    %44 = vector.extract_strided_slice %39 {offsets = [0, 16], sizes = [32, 8], strides = [1, 1]} : vector<32x96xbf16> to vector<32x8xbf16>
    %45 = vector.shape_cast %44 : vector<32x8xbf16> to vector<1x32x8xbf16>
    %46 = vector.extract_strided_slice %39 {offsets = [0, 24], sizes = [32, 8], strides = [1, 1]} : vector<32x96xbf16> to vector<32x8xbf16>
    %47 = vector.shape_cast %46 : vector<32x8xbf16> to vector<1x32x8xbf16>
    %48 = vector.shape_cast %41 : vector<1x32x8xbf16> to vector<1x1x32x8xbf16>
    %49 = vector.shape_cast %43 : vector<1x32x8xbf16> to vector<1x1x32x8xbf16>
    %50 = vector.shape_cast %45 : vector<1x32x8xbf16> to vector<1x1x32x8xbf16>
    %51 = vector.shape_cast %47 : vector<1x32x8xbf16> to vector<1x1x32x8xbf16>
    %52 = tpu.concatenate %48, %49, %50, %51 in 0 : vector<1x1x32x8xbf16>, vector<1x1x32x8xbf16>, vector<1x1x32x8xbf16>, vector<1x1x32x8xbf16> -> vector<4x1x32x8xbf16>
    %53 = vector.shape_cast %52 : vector<4x1x32x8xbf16> to vector<4x32x8xbf16>
    %54 = vector.extract_strided_slice %39 {offsets = [0, 32], sizes = [32, 8], strides = [1, 1]} : vector<32x96xbf16> to vector<32x8xbf16>
    %55 = vector.shape_cast %54 : vector<32x8xbf16> to vector<1x32x8xbf16>
    %56 = vector.extract_strided_slice %39 {offsets = [0, 40], sizes = [32, 8], strides = [1, 1]} : vector<32x96xbf16> to vector<32x8xbf16>
    %57 = vector.shape_cast %56 : vector<32x8xbf16> to vector<1x32x8xbf16>
    %58 = vector.extract_strided_slice %39 {offsets = [0, 48], sizes = [32, 8], strides = [1, 1]} : vector<32x96xbf16> to vector<32x8xbf16>
    %59 = vector.shape_cast %58 : vector<32x8xbf16> to vector<1x32x8xbf16>
    %60 = vector.extract_strided_slice %39 {offsets = [0, 56], sizes = [32, 8], strides = [1, 1]} : vector<32x96xbf16> to vector<32x8xbf16>
    %61 = vector.shape_cast %60 : vector<32x8xbf16> to vector<1x32x8xbf16>
    %62 = vector.shape_cast %55 : vector<1x32x8xbf16> to vector<1x1x32x8xbf16>
    %63 = vector.shape_cast %57 : vector<1x32x8xbf16> to vector<1x1x32x8xbf16>
    %64 = vector.shape_cast %59 : vector<1x32x8xbf16> to vector<1x1x32x8xbf16>
    %65 = vector.shape_cast %61 : vector<1x32x8xbf16> to vector<1x1x32x8xbf16>
    %66 = tpu.concatenate %62, %63, %64, %65 in 0 : vector<1x1x32x8xbf16>, vector<1x1x32x8xbf16>, vector<1x1x32x8xbf16>, vector<1x1x32x8xbf16> -> vector<4x1x32x8xbf16>
    %67 = vector.shape_cast %66 : vector<4x1x32x8xbf16> to vector<4x32x8xbf16>
    %68 = vector.extract_strided_slice %39 {offsets = [0, 64], sizes = [32, 8], strides = [1, 1]} : vector<32x96xbf16> to vector<32x8xbf16>
    %69 = vector.shape_cast %68 : vector<32x8xbf16> to vector<1x32x8xbf16>
    %70 = vector.extract_strided_slice %39 {offsets = [0, 72], sizes = [32, 8], strides = [1, 1]} : vector<32x96xbf16> to vector<32x8xbf16>
    %71 = vector.shape_cast %70 : vector<32x8xbf16> to vector<1x32x8xbf16>
    %72 = vector.extract_strided_slice %39 {offsets = [0, 80], sizes = [32, 8], strides = [1, 1]} : vector<32x96xbf16> to vector<32x8xbf16>
    %73 = vector.shape_cast %72 : vector<32x8xbf16> to vector<1x32x8xbf16>
    %74 = vector.extract_strided_slice %39 {offsets = [0, 88], sizes = [32, 8], strides = [1, 1]} : vector<32x96xbf16> to vector<32x8xbf16>
    %75 = vector.shape_cast %74 : vector<32x8xbf16> to vector<1x32x8xbf16>
    %76 = vector.shape_cast %69 : vector<1x32x8xbf16> to vector<1x1x32x8xbf16>
    %77 = vector.shape_cast %71 : vector<1x32x8xbf16> to vector<1x1x32x8xbf16>
    %78 = vector.shape_cast %73 : vector<1x32x8xbf16> to vector<1x1x32x8xbf16>
    %79 = vector.shape_cast %75 : vector<1x32x8xbf16> to vector<1x1x32x8xbf16>
    %80 = tpu.concatenate %76, %77, %78, %79 in 0 : vector<1x1x32x8xbf16>, vector<1x1x32x8xbf16>, vector<1x1x32x8xbf16>, vector<1x1x32x8xbf16> -> vector<4x1x32x8xbf16>
    %81 = vector.shape_cast %80 : vector<4x1x32x8xbf16> to vector<4x32x8xbf16>
    "tpu.trace_start"() <{level = 10 : i32, message = "gqd,gkd->gqk"}> : () -> ()
    %cst_20 = arith.constant dense<0.000000e+00> : vector<4x32x32xf32>
    %82 = tpu.matmul %53, %67, %cst_20 {dimension_numbers = #tpu.dot_dimension_numbers<[2], [2], [1], [1], [0, 0, 0, 1, 1, 1], [0], [0]>} : vector<4x32x8xbf16>, vector<4x32x8xbf16>, vector<4x32x32xf32> -> vector<4x32x32xf32>
    "tpu.trace_stop"() : () -> ()
    %cst_21 = arith.constant 0.353553385 : f32
    %83 = vector.broadcast %cst_21 : f32 to vector<4x32x32xf32>
    %84 = arith.mulf %82, %83 : vector<4x32x32xf32>
    %85 = tpu.iota {dimensions = array<i32: 2>} : vector<1x1x32xi32>
    %c17_i32 = arith.constant 17 : i32
    %86 = vector.broadcast %c17_i32 : i32 to vector<1x1x32xi32>
    %87 = arith.cmpi slt, %85, %86 : vector<1x1x32xi32>
    %cst_22 = arith.constant -1.000000e+30 : f32
    %88 = vector.shape_cast %87 : vector<1x1x32xi1> to vector<1x1x32xi1>
    %89 = vector.broadcast %88 : vector<1x1x32xi1> to vector<4x32x32xi1>
    %90 = vector.broadcast %cst_22 : f32 to vector<4x32x32xf32>
    %91 = arith.select %89, %84, %90 : vector<4x32x32xi1>, vector<4x32x32xf32>
    %cst_23 = arith.constant dense<0xFF800000> : vector<4x32xf32>
    %92 = vector.multi_reduction <maximumf>, %91, %cst_23 [2] : vector<4x32x32xf32> to vector<4x32xf32>
    %93 = vector.shape_cast %92 : vector<4x32xf32> to vector<4x32x1xf32>
    %94 = vector.broadcast %93 : vector<4x32x1xf32> to vector<4x32x32xf32>
    %95 = arith.subf %91, %94 : vector<4x32x32xf32>
    %96 = math.exp %95 : vector<4x32x32xf32>
    %cst_24 = arith.constant dense<0.000000e+00> : vector<4x32xf32>
    %97 = vector.multi_reduction <add>, %96, %cst_24 [2] : vector<4x32x32xf32> to vector<4x32xf32>
    %98 = vector.shape_cast %97 : vector<4x32xf32> to vector<4x32x1xf32>
    %99 = tpu.reciprocal %98 {approx = true} : vector<4x32x1xf32> -> vector<4x32x1xf32>
    %100 = vector.broadcast %99 : vector<4x32x1xf32> to vector<4x32x32xf32>
    %101 = arith.mulf %96, %100 : vector<4x32x32xf32>
    %102 = arith.truncf %101 : vector<4x32x32xf32> to vector<4x32x32xbf16>
    "tpu.trace_start"() <{level = 10 : i32, message = "gqk,gkd->gqd"}> : () -> ()
    %cst_25 = arith.constant dense<0.000000e+00> : vector<4x32x8xf32>
    %103 = tpu.matmul %102, %81, %cst_25 {dimension_numbers = #tpu.dot_dimension_numbers<[2], [1], [1], [2], [0, 0, 0, 1, 1, 2], [0], [0]>} : vector<4x32x32xbf16>, vector<4x32x8xbf16>, vector<4x32x8xf32> -> vector<4x32x8xf32>
    "tpu.trace_stop"() : () -> ()
    %104 = vector.extract_strided_slice %103 {offsets = [0, 0, 0], sizes = [1, 32, 8], strides = [1, 1, 1]} : vector<4x32x8xf32> to vector<1x32x8xf32>
    %105 = vector.extract_strided_slice %103 {offsets = [1, 0, 0], sizes = [1, 32, 8], strides = [1, 1, 1]} : vector<4x32x8xf32> to vector<1x32x8xf32>
    %106 = vector.extract_strided_slice %103 {offsets = [2, 0, 0], sizes = [1, 32, 8], strides = [1, 1, 1]} : vector<4x32x8xf32> to vector<1x32x8xf32>
    %107 = vector.extract_strided_slice %103 {offsets = [3, 0, 0], sizes = [1, 32, 8], strides = [1, 1, 1]} : vector<4x32x8xf32> to vector<1x32x8xf32>
    %108 = tpu.concatenate %104, %105, %106, %107 in 2 : vector<1x32x8xf32>, vector<1x32x8xf32>, vector<1x32x8xf32>, vector<1x32x8xf32> -> vector<1x32x32xf32>
    %109 = vector.shape_cast %108 : vector<1x32x32xf32> to vector<32x32xf32>
    %110 = arith.truncf %109 : vector<32x32xf32> to vector<32x32xbf16>
    %c0_26 = arith.constant 0 : index
    %c0_27 = arith.constant 0 : index
    %c0_28 = arith.constant 0 : index
    %111 = vector.load %arg9[%c0_26, %c0_27, %c0_28] : memref<1x32x32xbf16, #tpu.memory_space<vmem>>, vector<1x32x32xbf16>
    %112 = vector.shape_cast %111 : vector<1x32x32xbf16> to vector<32x32xbf16>
    %cst_29 = arith.constant dense<0.000000e+00> : vector<32x32xf32>
    %113 = tpu.matmul %110, %112, %cst_29 {dimension_numbers = #tpu.dot_dimension_numbers<[1], [0], [0], [1], [0, 0, 1, 1], [], []>} : vector<32x32xbf16>, vector<32x32xbf16>, vector<32x32xf32> -> vector<32x32xf32>
    %c0_30 = arith.constant 0 : index
    %c0_31 = arith.constant 0 : index
    %c0_32 = arith.constant 0 : index
    %114 = vector.load %arg10[%c0_30, %c0_31, %c0_32] : memref<1x1x32xf32, #tpu.memory_space<vmem>>, vector<1x1x32xf32>
    %115 = vector.shape_cast %114 : vector<1x1x32xf32> to vector<1x32xf32>
    %116 = vector.broadcast %115 : vector<1x32xf32> to vector<32x32xf32>
    %117 = arith.addf %113, %116 : vector<32x32xf32>
    %118 = arith.addf %4, %117 : vector<32x32xf32>
    %c0_33 = arith.constant 0 : index
    %c0_34 = arith.constant 0 : index
    %c0_35 = arith.constant 0 : index
    %119 = vector.load %arg11[%c0_33, %c0_34, %c0_35] : memref<1x1x32xf32, #tpu.memory_space<vmem>>, vector<1x1x32xf32>
    %120 = vector.shape_cast %119 : vector<1x1x32xf32> to vector<1x32xf32>
    %c0_36 = arith.constant 0 : index
    %c0_37 = arith.constant 0 : index
    %c0_38 = arith.constant 0 : index
    %121 = vector.load %arg12[%c0_36, %c0_37, %c0_38] : memref<1x1x32xf32, #tpu.memory_space<vmem>>, vector<1x1x32xf32>
    %122 = vector.shape_cast %121 : vector<1x1x32xf32> to vector<1x32xf32>
    %cst_39 = arith.constant dense<0.000000e+00> : vector<32xf32>
    %123 = vector.multi_reduction <add>, %118, %cst_39 [1] : vector<32x32xf32> to vector<32xf32>
    %124 = vector.shape_cast %123 : vector<32xf32> to vector<32x1xf32>
    %cst_40 = arith.constant 3.200000e+01 : f32
    %125 = vector.broadcast %cst_40 : f32 to vector<32x1xf32>
    %126 = arith.divf %124, %125 : vector<32x1xf32>
    %127 = vector.broadcast %126 : vector<32x1xf32> to vector<32x32xf32>
    %128 = arith.subf %118, %127 : vector<32x32xf32>
    %129 = arith.mulf %128, %128 : vector<32x32xf32>
    %cst_41 = arith.constant dense<0.000000e+00> : vector<32xf32>
    %130 = vector.multi_reduction <add>, %129, %cst_41 [1] : vector<32x32xf32> to vector<32xf32>
    %131 = vector.shape_cast %130 : vector<32xf32> to vector<32x1xf32>
    %cst_42 = arith.constant 3.200000e+01 : f32
    %132 = vector.broadcast %cst_42 : f32 to vector<32x1xf32>
    %133 = arith.divf %131, %132 : vector<32x1xf32>
    %134 = vector.broadcast %126 : vector<32x1xf32> to vector<32x32xf32>
    %135 = arith.subf %118, %134 : vector<32x32xf32>
    %cst_43 = arith.constant 9.99999974E-6 : f32
    %136 = vector.broadcast %cst_43 : f32 to vector<32x1xf32>
    %137 = arith.addf %133, %136 : vector<32x1xf32>
    %138 = math.rsqrt %137 : vector<32x1xf32>
    %139 = vector.broadcast %138 : vector<32x1xf32> to vector<32x32xf32>
    %140 = arith.mulf %135, %139 : vector<32x32xf32>
    %141 = vector.broadcast %120 : vector<1x32xf32> to vector<32x32xf32>
    %142 = arith.mulf %140, %141 : vector<32x32xf32>
    %143 = vector.broadcast %122 : vector<1x32xf32> to vector<32x32xf32>
    %144 = arith.addf %142, %143 : vector<32x32xf32>
    %145 = arith.truncf %144 : vector<32x32xf32> to vector<32x32xbf16>
    %c0_44 = arith.constant 0 : index
    %c0_45 = arith.constant 0 : index
    %c0_46 = arith.constant 0 : index
    %146 = vector.load %arg13[%c0_44, %c0_45, %c0_46] : memref<1x32x128xbf16, #tpu.memory_space<vmem>>, vector<1x32x128xbf16>
    %147 = vector.shape_cast %146 : vector<1x32x128xbf16> to vector<32x128xbf16>
    %cst_47 = arith.constant dense<0.000000e+00> : vector<32x128xf32>
    %148 = tpu.matmul %145, %147, %cst_47 {dimension_numbers = #tpu.dot_dimension_numbers<[1], [0], [0], [1], [0, 0, 1, 1], [], []>} : vector<32x32xbf16>, vector<32x128xbf16>, vector<32x128xf32> -> vector<32x128xf32>
    %c0_48 = arith.constant 0 : index
    %c0_49 = arith.constant 0 : index
    %c0_50 = arith.constant 0 : index
    %149 = vector.load %arg14[%c0_48, %c0_49, %c0_50] : memref<1x1x128xf32, #tpu.memory_space<vmem>>, vector<1x1x128xf32>
    %150 = vector.shape_cast %149 : vector<1x1x128xf32> to vector<1x128xf32>
    %151 = vector.broadcast %150 : vector<1x128xf32> to vector<32x128xf32>
    %152 = arith.addf %148, %151 : vector<32x128xf32>
    %cst_51 = arith.constant 5.000000e-01 : f32
    %153 = vector.broadcast %cst_51 : f32 to vector<32x128xf32>
    %154 = arith.mulf %153, %152 : vector<32x128xf32>
    %cst_52 = arith.constant 4.471500e-02 : f32
    %155 = vector.broadcast %cst_52 : f32 to vector<32x128xf32>
    %156 = arith.mulf %155, %152 : vector<32x128xf32>
    %157 = arith.mulf %156, %152 : vector<32x128xf32>
    %158 = arith.mulf %157, %152 : vector<32x128xf32>
    %159 = arith.addf %152, %158 : vector<32x128xf32>
    %cst_53 = arith.constant 0.797884583 : f32
    %160 = vector.broadcast %cst_53 : f32 to vector<32x128xf32>
    %161 = arith.mulf %160, %159 : vector<32x128xf32>
    %162 = math.tanh %161 : vector<32x128xf32>
    %cst_54 = arith.constant 1.000000e+00 : f32
    %163 = vector.broadcast %cst_54 : f32 to vector<32x128xf32>
    %164 = arith.addf %163, %162 : vector<32x128xf32>
    %165 = arith.mulf %154, %164 : vector<32x128xf32>
    %166 = arith.truncf %165 : vector<32x128xf32> to vector<32x128xbf16>
    %c0_55 = arith.constant 0 : index
    %c0_56 = arith.constant 0 : index
    %c0_57 = arith.constant 0 : index
    %167 = vector.load %arg15[%c0_55, %c0_56, %c0_57] : memref<1x128x32xbf16, #tpu.memory_space<vmem>>, vector<1x128x32xbf16>
    %168 = vector.shape_cast %167 : vector<1x128x32xbf16> to vector<128x32xbf16>
    %cst_58 = arith.constant dense<0.000000e+00> : vector<32x32xf32>
    %169 = tpu.matmul %166, %168, %cst_58 {dimension_numbers = #tpu.dot_dimension_numbers<[1], [0], [0], [1], [0, 0, 1, 1], [], []>} : vector<32x128xbf16>, vector<128x32xbf16>, vector<32x32xf32> -> vector<32x32xf32>
    %c0_59 = arith.constant 0 : index
    %c0_60 = arith.constant 0 : index
    %c0_61 = arith.constant 0 : index
    %170 = vector.load %arg16[%c0_59, %c0_60, %c0_61] : memref<1x1x32xf32, #tpu.memory_space<vmem>>, vector<1x1x32xf32>
    %171 = vector.shape_cast %170 : vector<1x1x32xf32> to vector<1x32xf32>
    %172 = vector.broadcast %171 : vector<1x32xf32> to vector<32x32xf32>
    %173 = arith.addf %169, %172 : vector<32x32xf32>
    %174 = arith.addf %118, %173 : vector<32x32xf32>
    %175 = vector.shape_cast %174 : vector<32x32xf32> to vector<1x32x32xf32>
    %c0_62 = arith.constant 0 : index
    %c0_63 = arith.constant 0 : index
    %c0_64 = arith.constant 0 : index
    %176 = vector.load %arg24[%c0_62, %c0_63, %c0_64] : memref<1x32x32xf32, #tpu.memory_space<vmem>>, vector<1x32x32xf32>
    tpu.vector_store %arg24[%c0_62, %c0_63, %c0_64], %175 {strides = array<i32>} : memref<1x32x32xf32, #tpu.memory_space<vmem>>, vector<1x32x32xf32>,
    %c1_i32 = arith.constant 1 : i32
    %177 = arith.cmpi eq, %arg1, %c1_i32 : i32
    %178 = arith.extui %177 : i1 to i32
    %c0_i32_65 = arith.constant 0 : i32
    %179 = arith.cmpi ne, %178, %c0_i32_65 : i32
    scf.if %179 {
      %180 = vector.shape_cast %174 : vector<32x32xf32> to vector<1x32x32xf32>
      %181 = vector.extract_strided_slice %180 {offsets = [0, 0, 0], sizes = [1, 1, 32], strides = [1, 1, 1]} : vector<1x32x32xf32> to vector<1x1x32xf32>
      %182 = vector.shape_cast %181 : vector<1x1x32xf32> to vector<1x32xf32>
      %c0_66 = arith.constant 0 : index
      %c0_67 = arith.constant 0 : index
      %183 = vector.load %arg17[%c0_66, %c0_67] : memref<1x32xf32, #tpu.memory_space<vmem>>, vector<1x32xf32>
      %c0_68 = arith.constant 0 : index
      %c0_69 = arith.constant 0 : index
      %184 = vector.load %arg18[%c0_68, %c0_69] : memref<1x32xf32, #tpu.memory_space<vmem>>, vector<1x32xf32>
      %cst_70 = arith.constant dense<0.000000e+00> : vector<1xf32>
      %185 = vector.multi_reduction <add>, %182, %cst_70 [1] : vector<1x32xf32> to vector<1xf32>
      %186 = vector.shape_cast %185 : vector<1xf32> to vector<1x1xf32>
      %cst_71 = arith.constant 3.200000e+01 : f32
      %187 = vector.broadcast %cst_71 : f32 to vector<1x1xf32>
      %188 = arith.divf %186, %187 : vector<1x1xf32>
      %189 = vector.broadcast %188 : vector<1x1xf32> to vector<1x32xf32>
      %190 = arith.subf %182, %189 : vector<1x32xf32>
      %191 = arith.mulf %190, %190 : vector<1x32xf32>
      %cst_72 = arith.constant dense<0.000000e+00> : vector<1xf32>
      %192 = vector.multi_reduction <add>, %191, %cst_72 [1] : vector<1x32xf32> to vector<1xf32>
      %193 = vector.shape_cast %192 : vector<1xf32> to vector<1x1xf32>
      %cst_73 = arith.constant 3.200000e+01 : f32
      %194 = vector.broadcast %cst_73 : f32 to vector<1x1xf32>
      %195 = arith.divf %193, %194 : vector<1x1xf32>
      %196 = vector.broadcast %188 : vector<1x1xf32> to vector<1x32xf32>
      %197 = arith.subf %182, %196 : vector<1x32xf32>
      %cst_74 = arith.constant 9.99999974E-6 : f32
      %198 = vector.broadcast %cst_74 : f32 to vector<1x1xf32>
      %199 = arith.addf %195, %198 : vector<1x1xf32>
      %200 = math.rsqrt %199 : vector<1x1xf32>
      %201 = vector.broadcast %200 : vector<1x1xf32> to vector<1x32xf32>
      %202 = arith.mulf %197, %201 : vector<1x32xf32>
      %203 = arith.mulf %202, %183 : vector<1x32xf32>
      %204 = arith.addf %203, %184 : vector<1x32xf32>
      %205 = arith.truncf %204 : vector<1x32xf32> to vector<1x32xbf16>
      %c0_75 = arith.constant 0 : index
      %c0_76 = arith.constant 0 : index
      %206 = vector.load %arg19[%c0_75, %c0_76] : memref<32x32xbf16, #tpu.memory_space<vmem>>, vector<32x32xbf16>
      %cst_77 = arith.constant dense<0.000000e+00> : vector<1x32xf32>
      %207 = tpu.matmul %205, %206, %cst_77 {dimension_numbers = #tpu.dot_dimension_numbers<[1], [0], [0], [1], [0, 0, 1, 1], [], []>} : vector<1x32xbf16>, vector<32x32xbf16>, vector<1x32xf32> -> vector<1x32xf32>
      %c0_78 = arith.constant 0 : index
      %c0_79 = arith.constant 0 : index
      %208 = vector.load %arg20[%c0_78, %c0_79] : memref<1x32xf32, #tpu.memory_space<vmem>>, vector<1x32xf32>
      %209 = arith.addf %207, %208 : vector<1x32xf32>
      %210 = math.tanh %209 : vector<1x32xf32>
      %211 = arith.truncf %210 : vector<1x32xf32> to vector<1x32xbf16>
      %c0_80 = arith.constant 0 : index
      %c0_81 = arith.constant 0 : index
      %212 = vector.load %arg21[%c0_80, %c0_81] : memref<32x10xbf16, #tpu.memory_space<vmem>>, vector<32x10xbf16>
      %cst_82 = arith.constant dense<0.000000e+00> : vector<1x10xf32>
      %213 = tpu.matmul %211, %212, %cst_82 {dimension_numbers = #tpu.dot_dimension_numbers<[1], [0], [0], [1], [0, 0, 1, 1], [], []>} : vector<1x32xbf16>, vector<32x10xbf16>, vector<1x10xf32> -> vector<1x10xf32>
      %c0_83 = arith.constant 0 : index
      %c0_84 = arith.constant 0 : index
      %214 = vector.load %arg22[%c0_83, %c0_84] : memref<1x10xf32, #tpu.memory_space<vmem>>, vector<1x10xf32>
      %215 = arith.addf %213, %214 : vector<1x10xf32>
      %c0_85 = arith.constant 0 : index
      %c0_86 = arith.constant 0 : index
      %c0_87 = arith.constant 0 : index
      %216 = vector.load %arg23[%c0_85, %c0_86, %c0_87] : memref<1x1x10xf32, #tpu.memory_space<vmem>>, vector<1x1x10xf32>
      %217 = vector.shape_cast %216 : vector<1x1x10xf32> to vector<1x10xf32>
      %218 = vector.shape_cast %215 : vector<1x10xf32> to vector<1x1x10xf32>
      tpu.vector_store %arg23[%c0_85, %c0_86, %c0_87], %218 {strides = array<i32>} : memref<1x1x10xf32, #tpu.memory_space<vmem>>, vector<1x1x10xf32>,
    } else {
    }
    return
  }
  func.func @transform_0(%arg0: i32, %arg1: i32) -> (i32, i32, i32) {
    %c0_i32 = arith.constant 0 : i32
    %c0_i32_0 = arith.constant 0 : i32
    %c0_i32_1 = arith.constant 0 : i32
    return %arg0, %c0_i32, %c0_i32_0 : i32, i32, i32
  }
  func.func @transform_1(%arg0: i32, %arg1: i32) -> (i32, i32) {
    %c0_i32 = arith.constant 0 : i32
    %c0_i32_0 = arith.constant 0 : i32
    %c0_i32_1 = arith.constant 0 : i32
    return %c0_i32, %c0_i32_0 : i32, i32
  }
  func.func @transform_2(%arg0: i32, %arg1: i32) -> (i32, i32, i32) {
    %c0_i32 = arith.constant 0 : i32
    %c0_i32_0 = arith.constant 0 : i32
    %c0_i32_1 = arith.constant 0 : i32
    %c0_i32_2 = arith.constant 0 : i32
    return %c0_i32, %c0_i32_0, %c0_i32_1 : i32, i32, i32
  }
  func.func @transform_3(%arg0: i32, %arg1: i32) -> (i32, i32, i32) {
    %c0_i32 = arith.constant 0 : i32
    %c0_i32_0 = arith.constant 0 : i32
    %c0_i32_1 = arith.constant 0 : i32
    return %arg1, %c0_i32, %c0_i32_0 : i32, i32, i32
  }
  func.func @transform_4(%arg0: i32, %arg1: i32) -> (i32, i32, i32) {
    %c0_i32 = arith.constant 0 : i32
    %c0_i32_0 = arith.constant 0 : i32
    %c0_i32_1 = arith.constant 0 : i32
    return %arg1, %c0_i32, %c0_i32_0 : i32, i32, i32
  }
  func.func @transform_5(%arg0: i32, %arg1: i32) -> (i32, i32, i32) {
    %c0_i32 = arith.constant 0 : i32
    %c0_i32_0 = arith.constant 0 : i32
    %c0_i32_1 = arith.constant 0 : i32
    return %arg1, %c0_i32, %c0_i32_0 : i32, i32, i32
  }
  func.func @transform_6(%arg0: i32, %arg1: i32) -> (i32, i32, i32) {
    %c0_i32 = arith.constant 0 : i32
    %c0_i32_0 = arith.constant 0 : i32
    %c0_i32_1 = arith.constant 0 : i32
    return %arg1, %c0_i32, %c0_i32_0 : i32, i32, i32
  }
  func.func @transform_7(%arg0: i32, %arg1: i32) -> (i32, i32, i32) {
    %c0_i32 = arith.constant 0 : i32
    %c0_i32_0 = arith.constant 0 : i32
    %c0_i32_1 = arith.constant 0 : i32
    return %arg1, %c0_i32, %c0_i32_0 : i32, i32, i32
  }
  func.func @transform_8(%arg0: i32, %arg1: i32) -> (i32, i32, i32) {
    %c0_i32 = arith.constant 0 : i32
    %c0_i32_0 = arith.constant 0 : i32
    %c0_i32_1 = arith.constant 0 : i32
    return %arg1, %c0_i32, %c0_i32_0 : i32, i32, i32
  }
  func.func @transform_9(%arg0: i32, %arg1: i32) -> (i32, i32, i32) {
    %c0_i32 = arith.constant 0 : i32
    %c0_i32_0 = arith.constant 0 : i32
    %c0_i32_1 = arith.constant 0 : i32
    return %arg1, %c0_i32, %c0_i32_0 : i32, i32, i32
  }
  func.func @transform_10(%arg0: i32, %arg1: i32) -> (i32, i32, i32) {
    %c0_i32 = arith.constant 0 : i32
    %c0_i32_0 = arith.constant 0 : i32
    %c0_i32_1 = arith.constant 0 : i32
    return %arg1, %c0_i32, %c0_i32_0 : i32, i32, i32
  }
  func.func @transform_11(%arg0: i32, %arg1: i32) -> (i32, i32, i32) {
    %c0_i32 = arith.constant 0 : i32
    %c0_i32_0 = arith.constant 0 : i32
    %c0_i32_1 = arith.constant 0 : i32
    return %arg1, %c0_i32, %c0_i32_0 : i32, i32, i32
  }
  func.func @transform_12(%arg0: i32, %arg1: i32) -> (i32, i32, i32) {
    %c0_i32 = arith.constant 0 : i32
    %c0_i32_0 = arith.constant 0 : i32
    %c0_i32_1 = arith.constant 0 : i32
    return %arg1, %c0_i32, %c0_i32_0 : i32, i32, i32
  }
  func.func @transform_13(%arg0: i32, %arg1: i32) -> (i32, i32, i32) {
    %c0_i32 = arith.constant 0 : i32
    %c0_i32_0 = arith.constant 0 : i32
    %c0_i32_1 = arith.constant 0 : i32
    return %arg1, %c0_i32, %c0_i32_0 : i32, i32, i32
  }
  func.func @transform_14(%arg0: i32, %arg1: i32) -> (i32, i32, i32) {
    %c0_i32 = arith.constant 0 : i32
    %c0_i32_0 = arith.constant 0 : i32
    %c0_i32_1 = arith.constant 0 : i32
    return %arg1, %c0_i32, %c0_i32_0 : i32, i32, i32
  }
  func.func @transform_15(%arg0: i32, %arg1: i32) -> (i32, i32) {
    %c0_i32 = arith.constant 0 : i32
    %c0_i32_0 = arith.constant 0 : i32
    %c0_i32_1 = arith.constant 0 : i32
    return %c0_i32, %c0_i32_0 : i32, i32
  }
  func.func @transform_16(%arg0: i32, %arg1: i32) -> (i32, i32) {
    %c0_i32 = arith.constant 0 : i32
    %c0_i32_0 = arith.constant 0 : i32
    %c0_i32_1 = arith.constant 0 : i32
    return %c0_i32, %c0_i32_0 : i32, i32
  }
  func.func @transform_17(%arg0: i32, %arg1: i32) -> (i32, i32) {
    %c0_i32 = arith.constant 0 : i32
    %c0_i32_0 = arith.constant 0 : i32
    %c0_i32_1 = arith.constant 0 : i32
    return %c0_i32, %c0_i32_0 : i32, i32
  }
  func.func @transform_18(%arg0: i32, %arg1: i32) -> (i32, i32) {
    %c0_i32 = arith.constant 0 : i32
    %c0_i32_0 = arith.constant 0 : i32
    %c0_i32_1 = arith.constant 0 : i32
    return %c0_i32, %c0_i32_0 : i32, i32
  }
  func.func @transform_19(%arg0: i32, %arg1: i32) -> (i32, i32) {
    %c0_i32 = arith.constant 0 : i32
    %c0_i32_0 = arith.constant 0 : i32
    %c0_i32_1 = arith.constant 0 : i32
    return %c0_i32, %c0_i32_0 : i32, i32
  }
  func.func @transform_20(%arg0: i32, %arg1: i32) -> (i32, i32) {
    %c0_i32 = arith.constant 0 : i32
    %c0_i32_0 = arith.constant 0 : i32
    %c0_i32_1 = arith.constant 0 : i32
    return %c0_i32, %c0_i32_0 : i32, i32
  }
  func.func @transform_21(%arg0: i32, %arg1: i32) -> (i32, i32, i32) {
    %c0_i32 = arith.constant 0 : i32
    %c0_i32_0 = arith.constant 0 : i32
    %c0_i32_1 = arith.constant 0 : i32
    return %arg0, %c0_i32, %c0_i32_0 : i32, i32, i32
  }
}

</mosaic_0001>

<bundles_post_ra>
// kernel: tpu_custom_call.1
= control target key start
LH: loop header
LB: loop body
LE: loop exit
PB: predicated region body
PF: predicated region fallthrough
CT: control target
= control target key end

     0   :  { %s4078_s0 = inlined_call_operand.vmem [shape: bf16[2,32,64], index: 0, kind: input, shape index: {}]   ;;  %s4079_s1 = inlined_call_operand.vmem [shape: bf16[64,32], index: 1, kind: input, shape index: {}]   ;;  %s4080_s2 = inlined_call_operand.vmem [shape: f32[1,32,32], index: 2, kind: input, shape index: {}]   ;;  %s4081_s3 = inlined_call_operand.vmem [shape: f32[2,1,32], index: 3, kind: input, shape index: {}]   ;;  %s4082_s4 = inlined_call_operand.vmem [shape: f32[2,1,32], index: 4, kind: input, shape index: {}]   ;;  %s4083_s5 = inlined_call_operand.vmem [shape: bf16[2,32,96], index: 5, kind: input, shape index: {}]   ;;  %s4084_s6 = inlined_call_operand.vmem [shape: f32[2,1,96], index: 6, kind: input, shape index: {}]   ;;  %s4085_s7 = inlined_call_operand.vmem [shape: bf16[2,32,32], index: 7, kind: input, shape index: {}]   ;;  %s4086_s8 = inlined_call_operand.vmem [shape: f32[2,1,32], index: 8, kind: input, shape index: {}]   ;;  %s4087_s9 = inlined_call_operand.vmem [shape: f32[2,1,32], index: 9, kind: input, shape index: {}]   ;;  %s4088_s10 = inlined_call_operand.vmem [shape: f32[2,1,32], index: 10, kind: input, shape index: {}]   ;;  %s4089_s11 = inlined_call_operand.vmem [shape: bf16[2,32,128], index: 11, kind: input, shape index: {}]   ;;  %s4090_s12 = inlined_call_operand.vmem [shape: f32[2,1,128], index: 12, kind: input, shape index: {}]   ;;  %s4091_s13 = inlined_call_operand.vmem [shape: bf16[2,128,32], index: 13, kind: input, shape index: {}]   ;;  %s4092_s14 = inlined_call_operand.vmem [shape: f32[2,1,32], index: 14, kind: input, shape index: {}]   ;;  %s4093_s15 = inlined_call_operand.vmem [shape: f32[1,32], index: 15, kind: input, shape index: {}]   ;;  %s4094_s16 = inlined_call_operand.vmem [shape: f32[1,32], index: 16, kind: input, shape index: {}]   ;;  %s4095_s17 = inlined_call_operand.vmem [shape: bf16[32,32], index: 17, kind: input, shape index: {}]   ;;  %s4096_s18 = inlined_call_operand.vmem [shape: f32[1,32], index: 18, kind: input, shape index: {}]   ;;  %s4097_s19 = inlined_call_operand.vmem [shape: bf16[32,10], index: 19, kind: input, shape index: {}]   ;;  %s4098_s20 = inlined_call_operand.vmem [shape: f32[1,10], index: 20, kind: input, shape index: {}]   ;;  %s4099_s21 = inlined_call_operand.hbm [shape: f32[2,1,10], index: 21, kind: output, shape index: {}]  }
   0x1   :  { %4117 = sst [smem:[#allocation18_spill]] %s4078_s0 }
   0x2   :  { %4118 = sst [smem:[#allocation19_spill]] %s4079_s1 }
   0x3   :  { %4119 = sst [smem:[#allocation20_spill]] %s4080_s2 }
   0x4   :  { %4120 = sst [smem:[#allocation21_spill]] %s4081_s3 }
   0x5   :  { %4121 = sst [smem:[#allocation22_spill]] %s4082_s4 }
   0x6   :  { %4122 = sst [smem:[#allocation23_spill]] %s4083_s5 }
   0x7   :  { %4123 = sst [smem:[#allocation24_spill]] %s4093_s15 }
   0x8   :  { %4124 = sst [smem:[#allocation25_spill]] %s4094_s16 }
   0x9   :  { %4125 = sst [smem:[#allocation26_spill]] %s4095_s17 }
   0xa   :  { %4126 = sst [smem:[#allocation27_spill]] %s4096_s18 }
   0xb   :  { %4127 = sst [smem:[#allocation28_spill]] %s4097_s19 }
   0xc   :  { %4128 = sst [smem:[#allocation29_spill]] %s4098_s20 }
   0xd   :  { %4129 = sst [smem:[#allocation30_spill]] %s4099_s21 }
   0xe   :  { %26 = vsyncpa [#allocation4], 0 }
   0xf   :  { %28 = vsyncpa [#allocation4 + $0x1], 0  ;;  %s3433_s2 = smov 0   ;;  %s3435_s25 = smov 0  }
  0x10   :  { %s3437_s26 = smov 0   ;;  %s3439_s27 = smov 0  }
  0x11   :  { %s3441_s3 = smov 0   ;;  %s3443_s28 = smov 0  }
  0x12   :  { %s3445_s29 = smov 0   ;;  %s3447_s0 = smov 0  }
  0x13 LB: > { %4130 = sst [smem:[#allocation6_spill]] %s3282_s2  ;;  %s2692_s4 = sadd.s32 4294967295, %s3310_s0   ;;  %s3310_s0 = sphi %s3447_s0, %s34_s0   ;;  %s3306_s29 = sphi %s3445_s29, %s4180_s29   ;;  %s3302_s28 = sphi %s3443_s28, %s4179_s28   ;;  %s3298_s3 = sphi %s3441_s3, %s4178_s3   ;;  %s3294_s27 = sphi %s3439_s27, %s4177_s27   ;;  %s3290_s26 = sphi %s3437_s26, %s4176_s26   ;;  %s3286_s25 = sphi %s3435_s25, %s4182_s25   ;;  %s3282_s2 = sphi %s3433_s2, %s4181_s2  }
  0x14   : > { %4131 = sst [smem:[#allocation7_spill]] %s3290_s26  ;;  %s2693_s30 = sadd.s32 4294967294, %s3310_s0  }
  0x15   : > { %4132 = sst [smem:[#allocation8_spill]] %s3294_s27  ;;  %s43_s5 = sadd.s32 1, %s3302_s28 }
  0x16   : > { %4133 = sst [smem:[#allocation9_spill]] %s3298_s3  ;;  %p44_p0 = scmp.ge.s32.totalorder %s43_s5, 2 }
  0x17   : > { %4134 = sst [smem:[#allocation10_spill]] %s3302_s28  ;;  %s46_s22 = sadd.s32 1, %s3306_s29 }
  0x18   : > { %4135 = sst [smem:[#allocation11_spill]] %s3306_s29  ;;  %p569_p1 = scmp.ne.s32.totalorder %s3290_s26, %s3286_s25 }
  0x19   : > { %4136 = sst [smem:[#allocation12_spill]] %s3310_s0  ;;  %p570_p2 = scmp.eq.s32.totalorder %s2692_s4, 3 }
  0x1a   : > { %s4184_s5 = smov (%p44_p0, %s43_s5), 0  ;;  %s4186_s22 = smov (!%p44_p0, %s46_s22), %s3306_s29 }
  0x1b   : > { %4137 = sst [smem:[#allocation13_spill]] %s4184_s5  ;;  %p3482_p3 = por %p570_p2, %p569_p1 }
  0x1c   : > { %p575_p4 = scmp.ne.s32.totalorder %s3286_s25, %s3282_s2  ;;  %p48_p5 = scmp.ge.s32.totalorder %s4186_s22, 2 }
  0x1d   : > { %s4138_s23 = scalar_select %p3482_p3, 1, 0 }
  0x1e   : > { %p576_p6 = scmp.eq.s32.totalorder %s2693_s30, 3  ;;  %p2696_p7 = scmp.ge.s32.totalorder %s3310_s0, 1 }
  0x1f   : > { %4139 = sst [smem:[#allocation14_spill]] %s4138_s23  ;;  %p706_p8 = scmp.lt.s32.totalorder %s3310_s0, 5 }
  0x20   : > { %s4188_s22 = smov (%p48_p5, %s4186_s22), 0  ;;  %p3492_p9 = por %p576_p6, %p575_p4 }
  0x21   : > { %4140 = sst [smem:[#allocation15_spill]] %s4188_s22  ;;  %p707_p10 = pnand %p2696_p7, %p706_p8 }
  0x22   : > { %s4141_s1 = scalar_select %p3492_p9, 1, 0 }
  0x23   : > { %s556_s24 = ssub.s32 %s3306_s29, %s4188_s22  ;;  %s559_s4 = sadd.s32 1, %s3290_s26 }
  0x24   : > { %4142 = sst [smem:[#allocation16_spill]] %s4141_s1  ;;  %p557_p11 = scmp.eq.s32.totalorder %s556_s24, 0 }
  0x25   : > { %710 = sbr.rel (%p707_p10) target bundleno = 3822 (0xeee), region = 104  ;;  %p809_p12 = scmp.lt.s32.totalorder (!%p707_p10), %s3298_s3, 1 }
  0x26   : > { %s3500_s5 = scalar_select %p557_p11, %s3290_s26, %s559_s4  }
  0x27   : > { %p814_p13 = scmp.lt.s32.totalorder (!%p707_p10), %s3294_s27, 1  ;;  %s4144_s29 = sld [smem:[#allocation18_spill]] (!%p707_p10) }
  0x28   : > { %4143 = sst [smem:[#allocation17_spill]] %s3500_s5  ;;  %s4147_s15 = sld [smem:[#allocation23_spill]] (!%p707_p10) }
  0x29   : > { %s4148_s16 = sand.u32 (!%p707_p10), 1, %s3286_s25   ;;  %s4149_s20 = sld [smem:[#allocation8_spill]] (!%p707_p10) }
  0x2c   : > { %s810_s28 = scalar_select %p809_p12, %s3298_s3, 1 }
  0x2d   : > { %s3507_s2 = scalar_select %p814_p13, %s3294_s27, 1 }
  0x2e   : > { %s2770_s24 = sshll.u32 %s810_s28, 4 }
  0x2f   : > { %s3512_s30 = scalar_lea.vmem %s4144_s29, %s2770_s24  ;;  %s2771_s18 = sshll.u32 %s3507_s2, 4 }
  0x30   : > { %s3526_s17 = scalar_lea.vmem %s4147_s15, %s2771_s18  ;;  %s3535_s4 = scalar_lea.vmem %s4085_s7, %s2771_s18 }
  0x31   : > { %s841_s19 = scalar_lea.vmem %s4088_s10, %s3507_s2  ;;  %s3552_s28 = scalar_lea.vmem %s4089_s11, %s2771_s18 }
  0x32   : > { %s2774_s0 = sshll.u32 %s3507_s2, 6  ;;  %s857_s21 = scalar_lea.vmem %s4092_s14, %s3507_s2 }
  0x33   : > { %s3566_s1 = scalar_lea.vmem %s4091_s13, %s2774_s0  ;;  %s3570_s15 = scalar_lea.vmem [#allocation3], %s4148_s16 }
  0x34   : > { %p2707_p0 = scmp.ne.s32.totalorder %s4149_s20, 0 }
  0x35   : > { %s4150_s29 = sld [smem:[#allocation19_spill]] (!%p2707_p0)  ;;  %vm909_vm0 = vcmask (!%p2707_p0), 523264   ;;  %v3070_v3 = vld [vmem:[%s3512_s30] sm:$0xff] (!%p2707_p0)   ;;  %v3071_v5 = vld [vmem:[%s3512_s30 + $0x8] sm:$0xff] (!%p2707_p0)   ;;  %s4152_s20 = sld [smem:[#allocation20_spill]] (!%p2707_p0)  ;;  %vm973_vm1 = vcmask (!%p2707_p0), 261120  }
  0x36   : > { %862 = sbr.rel (%p2707_p0) target bundleno = 294 (0x126), region = 108  ;;  %2849 = vmatprep.mubr.msk.bf16.mxu0 (!%p2707_p0), %vm909_vm0, %v3070_v3 }
  0x3b   : > { %s4151_s24 = smov (!%p2707_p0), %s4150_s29  ;;  %v3066_v0 = vld [vmem:[%s4150_s29] sm:$0xff] (!%p2707_p0)   ;;  %v967_v6 = vld [vmem:[%s4152_s20 + $0x10] sm:$0xff] (!%p2707_p0)  ;;  %v968_v9 = vld [vmem:[%s4152_s20 + $0x18] sm:$0xff] (!%p2707_p0) }
  0x3c   : > { %v3067_v1 = vld [vmem:[%s4151_s24 + $0x8] sm:$0xff] (!%p2707_p0)   ;;  %2841 = vmatprep.subr.bf16.mxu0 (!%p2707_p0), %v3066_v0  ;;  %v3068_v2 = vld [vmem:[%s4151_s24 + $0x10] sm:$0xff] (!%p2707_p0)   ;;  %v3069_v4 = vld [vmem:[%s4151_s24 + $0x18] sm:$0xff] (!%p2707_p0)  }
  0x3d   : > { %2842 = vmatpush3.bf16.msra.mxu0 %v3066_v0  ;;  %v965_v7 = vld [vmem:[%s4152_s20] sm:$0xff]  ;;  %v966_v12 = vld [vmem:[%s4152_s20 + $0x8] sm:$0xff] }
  0x3e   : > { %2843 = vmatprep.subr.bf16.mxu0 %v3067_v1 }
  0x41   : > { %2844 = vmatpush3.bf16.msra.mxu0 %v3067_v1 }
  0x42   : > { %2845 = vmatprep.subr.bf16.mxu0 %v3068_v2 }
  0x45   : > { %2846 = vmatpush3.bf16.msra.mxu0 %v3068_v2 }
  0x46   : > { %2847 = vmatprep.subr.bf16.mxu0 %v3069_v4 }
  0x49   : > { %2848 = vmatpush3.bf16.msra.mxu0 %v3069_v4 }
  0x4c   : > { %2850 = vmatmul.mubr.msk.bf16.vlgmr.msra.gmra.mrb[0].mxu0 %vm909_vm0, %v3071_v5 }
 0x11f   : > { %v2851_v8 = vpop.f32.mrb[0].mxu0 }
 0x120   : > { %v971_v10 = vadd.f32 %v2851_v8, %v967_v6  ;;  %v950_v11 = vpop.f32.mrb[1].mxu0 }
 0x121   : > { %v969_v13 = vadd.f32 %v965_v7, %v950_v11  ;;  %v2852_v14 = vpop.f32.mrb[2].mxu0 }
 0x122   : > { %976 = vst.msk [vmem:[#allocation2 + $0x10] sm:$0xff] %vm973_vm1, %v971_v10  ;;  %v972_v15 = vadd.f32 %v2852_v14, %v968_v9  ;;  %v953_v16 = vpop.f32.mrb[3].mxu0 }
 0x123   : > { %974 = vst.msk [vmem:[#allocation2] sm:$0xff] %vm973_vm1, %v969_v13  ;;  %v970_v17 = vadd.f32 %v966_v12, %v953_v16 }
 0x124   : > { %977 = vst.msk [vmem:[#allocation2 + $0x18] sm:$0xff] %vm973_vm1, %v972_v15 }
 0x125   : > { %975 = vst.msk [vmem:[#allocation2 + $0x8] sm:$0xff] %vm973_vm1, %v970_v17 }
 0x126 PF: > { %vm984_vm2 = vcmask 261120   ;;  %v3102_v46 = vld [vmem:[%s3526_s17] sm:$0xff]   ;;  %v3103_v47 = vld [vmem:[%s3526_s17 + $0x8] sm:$0xff]   ;;  %s4153_s3 = sld [smem:[#allocation21_spill]]  ;;  %s4155_s18 = sld [smem:[#allocation22_spill]]  ;;  %vm1158_vm3 = vcmask 64512  }
 0x127   : > { %2853 = vmatprep.subr.bf16.mxu0 %v3102_v46  ;;  %s4157_s0 = scalar_lea.vmem %s4084_s6, %s3507_s2  ;;  %s3312_s30 = smov 120   ;;  %vm1932_vm5 = vcmask 130048   ;;  %vm1937_vm6 = vcmask 195584  }
 0x128   : > { %2854 = vmatpush3.bf16.msra.mxu0 %v3102_v46  ;;  %v2718_v17 = vld [vmem:[%s4157_s0] ss:$0 sm:$0xff]  ;;  %s3313_s17 = smov 112   ;;  %s3314_s5 = smov 104  }
 0x129   : > { %v980_v19 = vld [vmem:[#allocation2 + $0x10] sm:$0xff]  ;;  %2855 = vmatprep.subr.bf16.mxu0 %v3103_v47  ;;  %s3317_s22 = smov 8   ;;  %s3318_s16 = smov 16  }
 0x12a   : > { %v978_v18 = vld [vmem:[#allocation2] sm:$0xff]  ;;  %v991_v22 = vsel %vm984_vm2, %v980_v19, 0.0  ;;  %s4158_s29 = scalar_lea.vmem %s4086_s8, %s3507_s2  ;;  %s4159_s0 = scalar_lea.vmem %s4087_s9, %s3507_s2 }
 0x12b   : > { %v985_v21 = vsel %vm984_vm2, %v978_v18, 0.0  ;;  %v981_v23 = vld [vmem:[#allocation2 + $0x18] sm:$0xff]  ;;  %992 = vadd.xlane.f32.xlu1 %v991_v22 }
 0x12c   : > { %v979_v20 = vld [vmem:[#allocation2 + $0x8] sm:$0xff]  ;;  %986 = vadd.xlane.f32.xlu0 %v985_v21  ;;  %v994_v25 = vsel %vm984_vm2, %v981_v23, 0.0  ;;  %2856 = vmatpush3.bf16.msra.mxu0 %v3103_v47  ;;  %s4154_s23 = scalar_lea.vmem %s4153_s3, %s3507_s2  ;;  %s4156_s27 = scalar_lea.vmem %s4155_s18, %s3507_s2 }
 0x12d   : > { %v988_v24 = vsel %vm984_vm2, %v979_v20, 0.0  ;;  %v2716_v62 = vld [vmem:[%s4154_s23] ss:$0 sm:$0xff]  ;;  %s3315_s3 = smov 96   ;;  %s3316_s23 = smov 64  }
 0x12e   : > { %v2717_v4 = vld [vmem:[%s4156_s27] ss:$0 sm:$0xff]  ;;  %s3319_s18 = smov 24  }
 0x12f   : > { %995 = vadd.xlane.f32.xlu1 %v994_v25 }
 0x130   : > { %989 = vadd.xlane.f32.xlu0 %v988_v24 }
 0x1b8   : > { %v993_v27 = vpop.xlane.xlu1 %992 }
 0x1b9   : > { %v987_v26 = vpop.xlane.xlu0 %986  ;;  %v1000_v29 = vmul.f32 0.03125, %v993_v27 }
 0x1ba   : > { %v998_v28 = vmul.f32 0.03125, %v987_v26 }
 0x1bb   : > { %v1004_v31 = vsub.f32 %v980_v19, %v1000_v29 }
 0x1bc   : > { %v1002_v30 = vsub.f32 %v978_v18, %v998_v28  ;;  %v996_v33 = vpop.xlane.xlu1 %995 }
 0x1bd   : > { %v990_v32 = vpop.xlane.xlu0 %989  ;;  %v1001_v35 = vmul.f32 0.03125, %v996_v33  ;;  %v1008_v37 = vmul.f32 %v1004_v31, %v1004_v31 }
 0x1be   : > { %v999_v34 = vmul.f32 0.03125, %v990_v32  ;;  %v1006_v36 = vmul.f32 %v1002_v30, %v1002_v30 }
 0x1bf   : > { %v1005_v39 = vsub.f32 %v981_v23, %v1001_v35  ;;  %v1016_v41 = vsel %vm984_vm2, %v1008_v37, 0.0 }
 0x1c0   : > { %v1003_v38 = vsub.f32 %v979_v20, %v999_v34  ;;  %v1010_v40 = vsel %vm984_vm2, %v1006_v36, 0.0 }
 0x1c1   : > { %1011 = vadd.xlane.f32.xlu0 %v1010_v40  ;;  %v1009_v43 = vmul.f32 %v1005_v39, %v1005_v39 }
 0x1c2   : > { %v1007_v42 = vmul.f32 %v1003_v38, %v1003_v38 }
 0x1c3   : > { %v1019_v45 = vsel %vm984_vm2, %v1009_v43, 0.0 }
 0x1c4   : > { %v1013_v44 = vsel %vm984_vm2, %v1007_v42, 0.0 }
 0x1c5   : > { %1017 = vadd.xlane.f32.xlu0 %v1016_v41  ;;  %1014 = vadd.xlane.f32.xlu1 %v1013_v44 }
 0x1c9   : > { %1020 = vadd.xlane.f32.xlu1 %v1019_v45 }
 0x24e   : > { %v1012_v48 = vpop.xlane.xlu0 %1011 }
 0x24f   : > { %v1022_v49 = vmul.f32 0.03125, %v1012_v48 }
 0x251   : > { %v1026_v50 = vadd.f32 1e-05, %v1022_v49  ;;  %v1431_v49 = vlaneseq }
 0x252   : > { %v1015_v51 = vpop.xlane.xlu1 %1014  ;;  %v1018_v52 = vpop.xlane.xlu0 %1017 }
 0x253   : > { %3116 = vrsqrt.f32 %v1026_v50  ;;  %v1023_v53 = vmul.f32 0.03125, %v1015_v51  ;;  %v1024_v54 = vmul.f32 0.03125, %v1018_v52  ;;  %v3688_v50 = vand.u32 127, %v1431_v49 }
 0x255   : > { %v1027_v55 = vadd.f32 1e-05, %v1023_v53  ;;  %v1028_v56 = vadd.f32 1e-05, %v1024_v54  ;;  %vm1433_vm4 = vcmp.lt.s32.totalorder %v3688_v50, 17 }
 0x256   : > { %v1021_v57 = vpop.xlane.xlu1 %1020 }
 0x257   : > { %3118 = vrsqrt.f32 %v1027_v55  ;;  %v1025_v58 = vmul.f32 0.03125, %v1021_v57 }
 0x258   : > { %3120 = vrsqrt.f32 %v1028_v56 }
 0x259   : > { %v1029_v59 = vadd.f32 1e-05, %v1025_v58 }
 0x25b   : > { %3122 = vrsqrt.f32 %v1029_v59 }
 0x25d   : > { %v3117_v60 = vpop.eup %3116 }
 0x25e   : > { %v1034_v61 = vmul.f32 %v3117_v60, %v1002_v30 }
 0x260   : > { %v1044_v2 = vmul.f32 %v2716_v62, %v1034_v61 }
 0x261   : > { %v3119_v63 = vpop.eup %3118 }
 0x262   : > { %v3121_v0 = vpop.eup %3120  ;;  %v1035_v1 = vmul.f32 %v3119_v63, %v1003_v38  ;;  %v1054_v8 = vadd.f32 %v2717_v4, %v1044_v2 }
 0x263   : > { %v1036_v3 = vmul.f32 %v3121_v0, %v1004_v31 }
 0x264   : > { %v1045_v5 = vmul.f32 %v2716_v62, %v1035_v1 }
 0x265   : > { %v3123_v6 = vpop.eup %3122  ;;  %v1046_v10 = vmul.f32 %v2716_v62, %v1036_v3 }
 0x266   : > { %v1037_v7 = vmul.f32 %v3123_v6, %v1005_v39  ;;  %v1055_v9 = vadd.f32 %v2717_v4, %v1045_v5 }
 0x267   : > { %v1056_v13 = vadd.f32 %v2717_v4, %v1046_v10 }
 0x268   : > { %v1058_v11 = vpack.c.bf16 %v1055_v9, %v1054_v8  ;;  %v1047_v12 = vmul.f32 %v2716_v62, %v1037_v7 }
 0x26a   : > { %2857 = vmatprep.mubr.msk.bf16.mxu0 %vm984_vm2, %v1058_v11  ;;  %v1057_v14 = vadd.f32 %v2717_v4, %v1047_v12 }
 0x26c   : > { %v1059_v15 = vpack.c.bf16 %v1057_v14, %v1056_v13 }
 0x26e   : > { %2858 = vmatmul.mubr.msk.bf16.vlgmr.msra.gmra.mrb[0].mxu0 %vm984_vm2, %v1059_v15 }
 0x341   : > { %v2859_v16 = vpop.f32.mrb[0].mxu0 }
 0x342   : > { %v1123_v18 = vpop.f32.mrb[1].mxu0  ;;  %v1132_v20 = vadd.f32 %v2859_v16, %v2718_v17 }
 0x343   : > { %v2860_v19 = vpop.f32.mrb[2].mxu0  ;;  %v1124_v23 = vadd.f32 %v2718_v17, %v1123_v18 }
 0x344   : > { %v1135_v21 = vadd.f32 %v2860_v19, %v2718_v17  ;;  %v1126_v22 = vpop.f32.mrb[3].mxu0 }
 0x345   : > { %v1127_v24 = vadd.f32 %v2718_v17, %v1126_v22 }
 0x346   : > { %v3626_v25 = vpack.c.bf16 %v1135_v21, %v1132_v20 }
 0x347   : > { %v3628_v26 = vpack.c.bf16 %v1127_v24, %v1124_v23 }
 0x348   : > { %1144 = vrot.lane.b32.xlu1 %v3626_v25, %s3312_s30 }
 0x349   : > { %1142 = vrot.lane.b32.xlu0 %v3628_v26, %s3312_s30  ;;  %2865 = vmatprep.mubr.msk.bf16.mxu0 %vm1158_vm3, %v3628_v26 }
 0x34c   : > { %1146 = vrot.lane.b32.xlu1 %v3628_v26, %s3313_s17 }
 0x34d   : > { %1148 = vrot.lane.b32.xlu0 %v3626_v25, %s3313_s17 }
 0x350   : > { %1150 = vrot.lane.b32.xlu1 %v3628_v26, %s3314_s5 }
 0x351   : > { %1154 = vrot.lane.b32.xlu0 %v3628_v26, %s3315_s3 }
 0x354   : > { %1152 = vrot.lane.b32.xlu1 %v3626_v25, %s3314_s5 }
 0x358   : > { %1156 = vrot.lane.b32.xlu1 %v3626_v25, %s3315_s3 }
 0x3ba   : > { %v3640_v27 = vpop.permute.xlu1 %1144 }
 0x3bb   : > { %1222 = vrot.lane.b32.xlu1 %v3640_v27, %s3315_s3  ;;  %v3643_v28 = vpop.permute.xlu0 %1142 }
 0x3bc   : > { %1220 = vrot.lane.b32.xlu0 %v3643_v28, %s3315_s3 }
 0x3be   : > { %v3646_v29 = vpop.permute.xlu1 %1146 }
 0x3bf   : > { %2881 = vmatprep.mubr.msk.bf16.mxu1 %vm1158_vm3, %v3646_v29  ;;  %v3650_v30 = vpop.permute.xlu0 %1148 }
 0x3c0   : > { %1285 = vrot.lane.b32.xlu0 %v3646_v29, %s3315_s3 }
 0x3c2   : > { %v3653_v31 = vpop.permute.xlu1 %1150 }
 0x3c3   : > { %1350 = vrot.lane.b32.xlu1 %v3653_v31, %s3315_s3  ;;  %v1155_v32 = vpop.permute.xlu0 %1154 }
 0x3c4   : > { %v1166_v33 = vsel %vm1158_vm3, %v1155_v32, 0  ;;  %1287 = vrot.lane.b32.xlu0 %v3650_v30, %s3315_s3  ;;  %2977 = vmatprep.subr.msk.bf16.mxu0 %vm1158_vm3, %v1155_v32 }
 0x3c5   : > { %2862 = vmatpush3.bf16.xpose.msra.mxu0 %v1166_v33 }
 0x3c6   : > { %v3659_v34 = vpop.permute.xlu1 %1152 }
 0x3c7   : > { %1352 = vrot.lane.b32.xlu1 %v3659_v34, %s3315_s3  ;;  %s4160_s3 = scalar_lea.vmem %s4090_s12, %s3507_s2  ;;  %s4161_s2 = sld [smem:[#allocation8_spill]] }
 0x3ca   : > { %v1157_v35 = vpop.permute.xlu1 %1156 }
 0x3cb   : > { %v1169_v36 = vsel %vm1158_vm3, %v1157_v35, 0  ;;  %2978 = vmatprep.subr.msk.bf16.mxu0 %vm1158_vm3, %v1157_v35 }
 0x3cd   : > { %2864 = vmatpush3.bf16.xpose.msra.mxu0 %v1169_v36  ;;  %p2760_p1 = scmp.ne.s32.totalorder %s4161_s2, 1 }
 0x3ce   : > { %vm2352_vm7 = vcmask (!%p2760_p1), 253952   ;;  %vm3321_vm8 = vmmov (!%p2760_p1), 0   ;;  %s4164_s30 = sld [smem:[#allocation25_spill]] (!%p2760_p1)  ;;  %s4165_s5 = sld [smem:[#allocation28_spill]] (!%p2760_p1)  ;;  %vm2491_vm9 = vcmask (!%p2760_p1), 73728  }
 0x3d4   : > { %2866 = vmatmul.mubr.msk.bf16.vlgmr.msra.gmra.mrb[4].mxu0 %vm1158_vm3, %v3626_v25 }
 0x3d5   : > { %2873 = vmatprep.mubr.msk.bf16.mxu0 %vm1158_vm3, %v3643_v28 }
 0x42d   : > { %v1223_v39 = vpop.permute.xlu1 %1222 }
 0x42e   : > { %v1221_v37 = vpop.permute.xlu0 %1220  ;;  %v1234_v43 = vsel %vm1158_vm3, %v1223_v39, 0 }
 0x42f   : > { %v1231_v38 = vsel %vm1158_vm3, %v1221_v37, 0  ;;  %2979 = vmatprep.subr.msk.bf16.mxu0 %vm1158_vm3, %v1221_v37 }
 0x430   : > { %2870 = vmatpush3.bf16.xpose.msra.mxu0 %v1231_v38 }
 0x431   : > { %2980 = vmatprep.subr.msk.bf16.mxu0 %vm1158_vm3, %v1223_v39 }
 0x432   : > { %v1286_v40 = vpop.permute.xlu0 %1285 }
 0x433   : > { %2981 = vmatprep.subr.msk.bf16.mxu1 %vm1158_vm3, %v1286_v40  ;;  %v1296_v41 = vsel %vm1158_vm3, %v1286_v40, 0 }
 0x434   : > { %2878 = vmatpush3.bf16.xpose.msra.mxu1 %v1296_v41 }
 0x435   : > { %v1351_v44 = vpop.permute.xlu1 %1350 }
 0x436   : > { %v1288_v42 = vpop.permute.xlu0 %1287  ;;  %v1361_v46 = vsel %vm1158_vm3, %v1351_v44, 0 }
 0x437   : > { %2982 = vmatprep.subr.msk.bf16.mxu1 %vm1158_vm3, %v1288_v42  ;;  %v1299_v45 = vsel %vm1158_vm3, %v1288_v42, 0 }
 0x438   : > { %2872 = vmatpush3.bf16.xpose.msra.mxu0 %v1234_v43 }
 0x439   : > { %2983 = vmatprep.subr.msk.bf16.mxu0 %vm1158_vm3, %v1351_v44  ;;  %v1353_v47 = vpop.permute.xlu1 %1352 }
 0x43a   : > { %v1364_v48 = vsel %vm1158_vm3, %v1353_v47, 0 }
 0x43c   : > { %2880 = vmatpush3.bf16.xpose.msra.mxu1 %v1299_v45 }
 0x43f   : > { %2874 = vmatmul.mubr.msk.bf16.vlgmr.msra.gmra.mrb[8].mxu0 %vm1158_vm3, %v3640_v27 }
 0x440   : > { %2886 = vmatpush3.bf16.xpose.msra.mxu0 %v1361_v46  ;;  %2889 = vmatprep.mubr.msk.bf16.mxu0 %vm1158_vm3, %v3653_v31 }
 0x441   : > { %2984 = vmatprep.subr.msk.bf16.mxu0 %vm1158_vm3, %v1353_v47 }
 0x443   : > { %2882 = vmatmul.mubr.msk.bf16.vlgmr.msra.gmra.mrb[0].mxu1 %vm1158_vm3, %v3650_v30 }
 0x448   : > { %2888 = vmatpush3.bf16.xpose.msra.mxu0 %v1364_v48 }
 0x44f   : > { %2890 = vmatmul.mubr.msk.bf16.vlgmr.msra.gmra.mrb[12].mxu0 %vm1158_vm3, %v3659_v34 }
 0x4a7   : > { %v2867_v51 = vpop.f32.mrb[4].mxu0 }
 0x4a8   : > { %v1417_v52 = vmul.f32 0.35355338, %v2867_v51  ;;  %v1205_v53 = vpop.f32.mrb[5].mxu0 }
 0x4a9   : > { %v1415_v54 = vmul.f32 0.35355338, %v1205_v53  ;;  %v2868_v55 = vpop.f32.mrb[6].mxu0 }
 0x4aa   : > { %v1208_v56 = vpop.f32.mrb[7].mxu0  ;;  %v3693_v57 = vsel %vm1433_vm4, %v1417_v52, -1e+30  ;;  %v1418_v60 = vmul.f32 0.35355338, %v2868_v55 }
 0x4ab   : > { %v1416_v58 = vmul.f32 0.35355338, %v1208_v56  ;;  %v1458_v59 = vsel %vm984_vm2, %v3693_v57, -inf  ;;  %v3699_v61 = vsel %vm1433_vm4, %v1415_v54, -1e+30 }
 0x4ac   : > { %1459 = vmax.xlane.f32.xlu0 %v1458_v59  ;;  %v1452_v0 = vsel %vm984_vm2, %v3699_v61, -inf  ;;  %v3711_v1 = vsel %vm1433_vm4, %v1418_v60, -1e+30 }
 0x4ad   : > { %v3703_v62 = vsel %vm1433_vm4, %v1416_v58, -1e+30  ;;  %v1461_v2 = vsel %vm984_vm2, %v3711_v1, -inf }
 0x4ae   : > { %v1455_v63 = vsel %vm984_vm2, %v3703_v62, -inf }
 0x4af   : > { %1456 = vmax.xlane.f32.xlu1 %v1455_v63 }
 0x4b0   : > { %1453 = vmax.xlane.f32.xlu0 %v1452_v0 }
 0x4b4   : > { %1462 = vmax.xlane.f32.xlu0 %v1461_v2 }
 0x512   : > { %v2875_v3 = vpop.f32.mrb[8].mxu0 }
 0x513   : > { %v1421_v4 = vmul.f32 0.35355338, %v2875_v3  ;;  %v1270_v5 = vpop.f32.mrb[9].mxu0 }
 0x514   : > { %v2876_v6 = vpop.f32.mrb[10].mxu0  ;;  %v1419_v10 = vmul.f32 0.35355338, %v1270_v5 }
 0x515   : > { %v1422_v7 = vmul.f32 0.35355338, %v2876_v6  ;;  %v1273_v8 = vpop.f32.mrb[11].mxu0  ;;  %v3717_v9 = vsel %vm1433_vm4, %v1421_v4, -1e+30 }
 0x516   : > { %v2883_v11 = vpop.f32.mrb[0].mxu1  ;;  %v1470_v12 = vsel %vm984_vm2, %v3717_v9, -inf  ;;  %v1420_v16 = vmul.f32 0.35355338, %v1273_v8  ;;  %v3739_v32 = vsel %vm1433_vm4, %v1419_v10, -1e+30 }
 0x517   : > { %v1425_v13 = vmul.f32 0.35355338, %v2883_v11  ;;  %v1335_v14 = vpop.f32.mrb[1].mxu1  ;;  %1471 = vmax.xlane.f32.xlu0 %v1470_v12  ;;  %v3723_v15 = vsel %vm1433_vm4, %v1422_v7, -1e+30  ;;  %v1464_v37 = vsel %vm984_vm2, %v3739_v32, -inf }
 0x518   : > { %v2884_v17 = vpop.f32.mrb[2].mxu1  ;;  %v1473_v18 = vsel %vm984_vm2, %v3723_v15, -inf  ;;  %v1423_v23 = vmul.f32 0.35355338, %v1335_v14  ;;  %v3745_v36 = vsel %vm1433_vm4, %v1420_v16, -1e+30 }
 0x519   : > { %v1426_v19 = vmul.f32 0.35355338, %v2884_v17  ;;  %v1338_v20 = vpop.f32.mrb[3].mxu1  ;;  %1474 = vmax.xlane.f32.xlu1 %v1473_v18  ;;  %v3729_v21 = vsel %vm1433_vm4, %v1425_v13, -1e+30  ;;  %v1467_v39 = vsel %vm984_vm2, %v3745_v36, -inf }
 0x51a   : > { %v1482_v22 = vsel %vm984_vm2, %v3729_v21, -inf  ;;  %v1424_v35 = vmul.f32 0.35355338, %v1338_v20  ;;  %v3751_v38 = vsel %vm1433_vm4, %v1423_v23, -1e+30 }
 0x51b   : > { %1483 = vmax.xlane.f32.xlu0 %v1482_v22  ;;  %v3735_v24 = vsel %vm1433_vm4, %v1426_v19, -1e+30  ;;  %v1476_v42 = vsel %vm984_vm2, %v3751_v38, -inf }
 0x51c   : > { %v1485_v33 = vsel %vm984_vm2, %v3735_v24, -inf  ;;  %v3757_v40 = vsel %vm1433_vm4, %v1424_v35, -1e+30 }
 0x51d   : > { %1486 = vmax.xlane.f32.xlu1 %v1485_v33  ;;  %v1479_v47 = vsel %vm984_vm2, %v3757_v40, -inf }
 0x51f   : > { %1465 = vmax.xlane.f32.xlu0 %v1464_v37 }
 0x521   : > { %1468 = vmax.xlane.f32.xlu1 %v1467_v39 }
 0x522   : > { %v2891_v41 = vpop.f32.mrb[12].mxu0 }
 0x523   : > { %v1429_v43 = vmul.f32 0.35355338, %v2891_v41  ;;  %1477 = vmax.xlane.f32.xlu0 %v1476_v42  ;;  %v1400_v44 = vpop.f32.mrb[13].mxu0 }
 0x524   : > { %v1427_v45 = vmul.f32 0.35355338, %v1400_v44  ;;  %v2892_v46 = vpop.f32.mrb[14].mxu0 }
 0x525   : > { %1480 = vmax.xlane.f32.xlu1 %v1479_v47  ;;  %v1403_v48 = vpop.f32.mrb[15].mxu0  ;;  %v3765_v49 = vsel %vm1433_vm4, %v1429_v43, -1e+30  ;;  %v1430_v60 = vmul.f32 0.35355338, %v2892_v46 }
 0x526   : > { %v1494_v51 = vsel %vm984_vm2, %v3765_v49, -inf  ;;  %v3771_v52 = vsel %vm1433_vm4, %v1427_v45, -1e+30 }
 0x527   : > { %1495 = vmax.xlane.f32.xlu0 %v1494_v51  ;;  %v1488_v53 = vsel %vm984_vm2, %v3771_v52, -inf }
 0x52b   : > { %1489 = vmax.xlane.f32.xlu0 %v1488_v53 }
 0x536   : > { %1697 = vrot.lane.b32.xlu1 %v3643_v28, %s3316_s23 }
 0x539   : > { %v1460_v54 = vpop.xlane.xlu0 %1459 }
 0x53a   : > { %1638 = vrot.lane.b32.xlu1 %v3626_v25, %s3316_s23  ;;  %v1502_v55 = vsub.f32 %v3693_v57, %v1460_v54  ;;  %v1428_v25 = vmul.f32 0.35355338, %v1403_v48 }
 0x53c   : > { %v1520_v58 = vmul.f32 1.442695, %v1502_v55  ;;  %v3797_v57 = vsel %vm1433_vm4, %v1428_v25, -1e+30  ;;  %v1457_v4 = vpop.xlane.xlu1 %1456 }
 0x53d   : > { %v1454_v56 = vpop.xlane.xlu0 %1453  ;;  %v1491_v0 = vsel %vm984_vm2, %v3797_v57, -inf  ;;  %v1501_v5 = vsub.f32 %v3703_v62, %v1457_v4 }
 0x53e   : > { %1699 = vrot.lane.b32.xlu1 %v3640_v27, %s3316_s23  ;;  %v1500_v59 = vsub.f32 %v3699_v61, %v1454_v56  ;;  %3124 = vpow2.f32 %v1520_v58  ;;  %v3789_v27 = vsel %vm1433_vm4, %v1430_v60, -1e+30 }
 0x53f   : > { %v1518_v7 = vmul.f32 1.442695, %v1501_v5 }
 0x540   : > { %v1516_v28 = vmul.f32 1.442695, %v1500_v59 }
 0x541   : > { %1636 = vrot.lane.b32.xlu0 %v3628_v26, %s3316_s23  ;;  %v1463_v50 = vpop.xlane.xlu0 %1462 }
 0x542   : > { %3126 = vpow2.f32 %v1516_v28  ;;  %v1503_v3 = vsub.f32 %v3711_v1, %v1463_v50 }
 0x544   : > { %v1522_v6 = vmul.f32 1.442695, %v1503_v3 }
 0x545   : > { %1758 = vrot.lane.b32.xlu0 %v3646_v29, %s3316_s23  ;;  %v1497_v29 = vsel %vm984_vm2, %v3789_v27, -inf }
 0x546   : > { %3128 = vpow2.f32 %v1522_v6 }
 0x547   : > { %3130 = vpow2.f32 %v1518_v7 }
 0x548   : > { %v3791_v26 = vpop.eup %3124 }
 0x549   : > { %v1554_v61 = vsel %vm984_vm2, %v3791_v26, 0.0 }
 0x54c   : > { %v3801_v63 = vpop.eup %3126 }
 0x54d   : > { %v1548_v2 = vsel %vm984_vm2, %v3801_v63, 0.0 }
 0x550   : > { %v3811_v8 = vpop.eup %3128 }
 0x551   : > { %v1557_v10 = vsel %vm984_vm2, %v3811_v8, 0.0  ;;  %v3815_v11 = vpop.eup %3130 }
 0x562   : > { %1498 = vmax.xlane.f32.xlu1 %v1497_v29 }
 0x564   : > { %1555 = vadd.xlane.f32.xlu0 %v1554_v61 }
 0x566   : > { %1492 = vmax.xlane.f32.xlu1 %v1491_v0 }
 0x568   : > { %1549 = vadd.xlane.f32.xlu0 %v1548_v2 }
 0x577   : > { %1819 = vrot.lane.b32.xlu1 %v3653_v31, %s3316_s23  ;;  %v1551_v31 = vsel %vm984_vm2, %v3815_v11, 0.0 }
 0x59b   : > { %1558 = vadd.xlane.f32.xlu1 %v1557_v10 }
 0x59f   : > { %1552 = vadd.xlane.f32.xlu1 %v1551_v31 }
 0x5a4   : > { %v1472_v1 = vpop.xlane.xlu0 %1471 }
 0x5a5   : > { %v1506_v12 = vsub.f32 %v3717_v9, %v1472_v1 }
 0x5a6   : > { %v1475_v62 = vpop.xlane.xlu1 %1474 }
 0x5a7   : > { %v1528_v13 = vmul.f32 1.442695, %v1506_v12  ;;  %v1507_v14 = vsub.f32 %v3723_v15, %v1475_v62 }
 0x5a8   : > { %v1484_v16 = vpop.xlane.xlu0 %1483 }
 0x5a9   : > { %3132 = vpow2.f32 %v1528_v13  ;;  %v1530_v17 = vmul.f32 1.442695, %v1507_v14  ;;  %v1510_v18 = vsub.f32 %v3729_v21, %v1484_v16 }
 0x5aa   : > { %v1487_v19 = vpop.xlane.xlu1 %1486 }
 0x5ab   : > { %3134 = vpow2.f32 %v1530_v17  ;;  %v1536_v20 = vmul.f32 1.442695, %v1510_v18  ;;  %v1511_v22 = vsub.f32 %v3735_v24, %v1487_v19 }
 0x5ac   : > { %v1466_v23 = vpop.xlane.xlu0 %1465 }
 0x5ad   : > { %3136 = vpow2.f32 %v1536_v20  ;;  %v1538_v33 = vmul.f32 1.442695, %v1511_v22  ;;  %v1504_v35 = vsub.f32 %v3739_v32, %v1466_v23 }
 0x5ae   : > { %v1469_v9 = vpop.xlane.xlu1 %1468 }
 0x5af   : > { %3138 = vpow2.f32 %v1538_v33  ;;  %v1524_v37 = vmul.f32 1.442695, %v1504_v35  ;;  %v1505_v15 = vsub.f32 %v3745_v36, %v1469_v9 }
 0x5b0   : > { %v1478_v39 = vpop.xlane.xlu0 %1477 }
 0x5b1   : > { %3140 = vpow2.f32 %v1524_v37  ;;  %v1526_v41 = vmul.f32 1.442695, %v1505_v15  ;;  %v1508_v21 = vsub.f32 %v3751_v38, %v1478_v39 }
 0x5b2   : > { %v1481_v42 = vpop.xlane.xlu1 %1480 }
 0x5b3   : > { %v3826_v43 = vpop.eup %3132  ;;  %3142 = vpow2.f32 %v1526_v41  ;;  %v1532_v24 = vmul.f32 1.442695, %v1508_v21  ;;  %v1509_v44 = vsub.f32 %v3757_v40, %v1481_v42 }
 0x5b4   : > { %v1496_v45 = vpop.xlane.xlu0 %1495  ;;  %v1566_v32 = vsel %vm984_vm2, %v3826_v43, 0.0 }
 0x5b5   : > { %v3831_v46 = vpop.eup %3134  ;;  %3144 = vpow2.f32 %v1532_v24  ;;  %v1534_v36 = vmul.f32 1.442695, %v1509_v44  ;;  %v1514_v47 = vsub.f32 %v3765_v49, %v1496_v45  ;;  %1567 = vadd.xlane.f32.xlu0 %v1566_v32 }
 0x5b6   : > { %v1698_v48 = vpop.permute.xlu1 %1697  ;;  %v1569_v38 = vsel %vm984_vm2, %v3831_v46, 0.0 }
 0x5b7   : > { %v3836_v51 = vpop.eup %3136  ;;  %3146 = vpow2.f32 %v1534_v36  ;;  %v1544_v53 = vmul.f32 1.442695, %v1514_v47  ;;  %2901 = vmatprep.subr.bf16.mxu0 %v1698_v48  ;;  %1570 = vadd.xlane.f32.xlu1 %v1569_v38 }
 0x5b8   : > { %2902 = vmatpush3.bf16.msra.mxu0 %v1698_v48  ;;  %v1490_v40 = vpop.xlane.xlu0 %1489  ;;  %v1578_v54 = vsel %vm984_vm2, %v3836_v51, 0.0 }
 0x5b9   : > { %v3840_v55 = vpop.eup %3138  ;;  %3148 = vpow2.f32 %v1544_v53  ;;  %v1512_v49 = vsub.f32 %v3771_v52, %v1490_v40  ;;  %1579 = vadd.xlane.f32.xlu0 %v1578_v54 }
 0x5ba   : > { %v1639_v56 = vpop.permute.xlu1 %1638  ;;  %v1581_v58 = vsel %vm984_vm2, %v3840_v55, 0.0 }
 0x5bb   : > { %v3845_v59 = vpop.eup %3140  ;;  %v1540_v28 = vmul.f32 1.442695, %v1512_v49  ;;  %1582 = vadd.xlane.f32.xlu1 %v1581_v58 }
 0x5bc   : > { %v1637_v60 = vpop.permute.xlu0 %1636  ;;  %v1560_v25 = vsel %vm984_vm2, %v3845_v59, 0.0 }
 0x5bd   : > { %v3849_v29 = vpop.eup %3142  ;;  %3150 = vpow2.f32 %v1540_v28  ;;  %1561 = vadd.xlane.f32.xlu0 %v1560_v25  ;;  %2893 = vmatprep.subr.bf16.mxu1 %v1637_v60 }
 0x5be   : > { %v1700_v61 = vpop.permute.xlu1 %1699  ;;  %2894 = vmatpush3.bf16.msra.mxu1 %v1637_v60  ;;  %v1563_v52 = vsel %vm984_vm2, %v3849_v29, 0.0 }
 0x5bf   : > { %v3853_v0 = vpop.eup %3144  ;;  %2895 = vmatprep.subr.bf16.mxu1 %v1639_v56  ;;  %2903 = vmatprep.subr.bf16.mxu0 %v1700_v61 }
 0x5c0   : > { %1564 = vadd.xlane.f32.xlu1 %v1563_v52  ;;  %2904 = vmatpush3.bf16.msra.mxu0 %v1700_v61  ;;  %v1572_v2 = vsel %vm984_vm2, %v3853_v0, 0.0  ;;  %v1759_v3 = vpop.permute.xlu0 %1758 }
 0x5c1   : > { %v3857_v50 = vpop.eup %3146  ;;  %1573 = vadd.xlane.f32.xlu0 %v1572_v2 }
 0x5c2   : > { %2896 = vmatpush3.bf16.msra.mxu1 %v1639_v56  ;;  %v1575_v4 = vsel %vm984_vm2, %v3857_v50, 0.0 }
 0x5c3   : > { %v3861_v5 = vpop.eup %3148  ;;  %2909 = vmatprep.subr.bf16.mxu1 %v1759_v3 }
 0x5c4   : > { %1576 = vadd.xlane.f32.xlu1 %v1575_v4  ;;  %v1590_v6 = vsel %vm984_vm2, %v3861_v5, 0.0 }
 0x5c5   : > { %1591 = vadd.xlane.f32.xlu0 %v1590_v6 }
 0x5c7   : > { %v3865_v7 = vpop.eup %3150 }
 0x5c8   : > { %v1584_v10 = vsel %vm984_vm2, %v3865_v7, 0.0 }
 0x5c9   : > { %1585 = vadd.xlane.f32.xlu0 %v1584_v10 }
 0x5df   : > { %1760 = vrot.lane.b32.xlu0 %v3650_v30, %s3316_s23 }
 0x5ef   : > { %v1499_v31 = vpop.xlane.xlu1 %1498 }
 0x5f0   : > { %v1515_v1 = vsub.f32 %v3789_v27, %v1499_v31 }
 0x5f2   : > { %v1546_v12 = vmul.f32 1.442695, %v1515_v1 }
 0x5f3   : > { %v1493_v62 = vpop.xlane.xlu1 %1492 }
 0x5f4   : > { %3152 = vpow2.f32 %v1546_v12  ;;  %v1513_v13 = vsub.f32 %v3797_v57, %v1493_v62  ;;  %v1556_v57 = vpop.xlane.xlu0 %1555 }
 0x5f6   : > { %v1542_v14 = vmul.f32 1.442695, %v1513_v13 }
 0x5f7   : > { %v3873_v16 = vpop.permute.xlu1 %1819 }
 0x5f8   : > { %3154 = vpow2.f32 %v1542_v14  ;;  %2917 = vmatprep.subr.bf16.mxu0 %v3873_v16  ;;  %v1550_v19 = vpop.xlane.xlu0 %1549 }
 0x5fe   : > { %v3876_v17 = vpop.eup %3152 }
 0x5ff   : > { %v1593_v18 = vsel %vm984_vm2, %v3876_v17, 0.0 }
 0x600   : > { %1594 = vadd.xlane.f32.xlu1 %v1593_v18 }
 0x602   : > { %v3880_v30 = vpop.eup %3154 }
 0x603   : > { %v1587_v27 = vsel %vm984_vm2, %v3880_v30, 0.0 }
 0x604   : > { %1588 = vadd.xlane.f32.xlu1 %v1587_v27 }
 0x615   : > { %1821 = vrot.lane.b32.xlu1 %v3659_v34, %s3316_s23 }
 0x628   : > { %v1559_v20 = vpop.xlane.xlu1 %1558 }
 0x629   : > { %3156 = vrcp.f32 %v1559_v20  ;;  %v3104_v20 = vld [vmem:[%s3535_s4] sm:$0xff]  }
 0x62a   : > { %3158 = vrcp.f32 %v1550_v19 }
 0x62b   : > { %3160 = vrcp.f32 %v1556_v57 }
 0x62c   : > { %v1553_v22 = vpop.xlane.xlu1 %1552 }
 0x62d   : > { %3162 = vrcp.f32 %v1553_v22 }
 0x633   : > { %v3157_v23 = vpop.eup %3156 }
 0x634   : > { %v3159_v33 = vpop.eup %3158  ;;  %v1615_v37 = vmul.f32 %v3157_v23, %v3811_v8 }
 0x635   : > { %v3161_v35 = vpop.eup %3160  ;;  %v1612_v15 = vmul.f32 %v3159_v33, %v3801_v63 }
 0x636   : > { %v1614_v34 = vmul.f32 %v3161_v35, %v3791_v26 }
 0x637   : > { %v3163_v9 = vpop.eup %3162 }
 0x638   : > { %v1613_v39 = vmul.f32 %v3163_v9, %v3815_v11  ;;  %v1629_v21 = vpack.c.bf16 %v1615_v37, %v1614_v34  ;;  %v3105_v34 = vld [vmem:[%s3535_s4 + $0x8] sm:$0xff]   ;;  %s4167_s4 = sld [smem:[#allocation29_spill]] (!%p2760_p1) }
 0x63a   : > { %v1628_v41 = vpack.c.bf16 %v1613_v39, %v1612_v15 }
 0x63c   : > { %2897 = vmatprep.mubr.msk.bf16.mxu1 %vm984_vm2, %v1628_v41 }
 0x63d   : > { %2898 = vmatmul.mubr.msk.bf16.vlgmr.msra.gmra.mrb[4].mxu1 %vm984_vm2, %v1629_v21 }
 0x63e   : > { %2910 = vmatpush3.bf16.msra.mxu1 %v1759_v3 }
 0x642   : > { %v1568_v42 = vpop.xlane.xlu0 %1567 }
 0x644   : > { %v1571_v24 = vpop.xlane.xlu1 %1570 }
 0x645   : > { %3164 = vrcp.f32 %v1571_v24 }
 0x646   : > { %v1580_v44 = vpop.xlane.xlu0 %1579 }
 0x648   : > { %v1583_v45 = vpop.xlane.xlu1 %1582 }
 0x64a   : > { %v1562_v32 = vpop.xlane.xlu0 %1561 }
 0x64b   : > { %3166 = vrcp.f32 %v1562_v32 }
 0x64c   : > { %3168 = vrcp.f32 %v1568_v42 }
 0x64d   : > { %v1565_v63 = vpop.xlane.xlu1 %1564 }
 0x64e   : > { %3170 = vrcp.f32 %v1565_v63  ;;  %v1574_v8 = vpop.xlane.xlu0 %1573 }
 0x64f   : > { %3172 = vrcp.f32 %v1583_v45  ;;  %v3165_v36 = vpop.eup %3164 }
 0x650   : > { %3174 = vrcp.f32 %v1574_v8  ;;  %v1619_v40 = vmul.f32 %v3165_v36, %v3831_v46 }
 0x651   : > { %3176 = vrcp.f32 %v1580_v44  ;;  %v1577_v26 = vpop.xlane.xlu1 %1576 }
 0x652   : > { %3178 = vrcp.f32 %v1577_v26  ;;  %v1592_v11 = vpop.xlane.xlu0 %1591 }
 0x655   : > { %v3167_v47 = vpop.eup %3166 }
 0x656   : > { %v1586_v48 = vpop.xlane.xlu0 %1585  ;;  %v3169_v38 = vpop.eup %3168  ;;  %v1616_v49 = vmul.f32 %v3167_v47, %v3845_v59 }
 0x657   : > { %v1618_v28 = vmul.f32 %v3169_v38, %v3826_v43 }
 0x658   : > { %v3171_v53 = vpop.eup %3170 }
 0x659   : > { %v3173_v54 = vpop.eup %3172  ;;  %v1617_v56 = vmul.f32 %v3171_v53, %v3849_v29  ;;  %v1631_v3 = vpack.c.bf16 %v1619_v40, %v1618_v28 }
 0x65a   : > { %v3175_v58 = vpop.eup %3174  ;;  %v1761_v60 = vpop.permute.xlu0 %1760  ;;  %v1623_v2 = vmul.f32 %v3173_v54, %v3840_v55 }
 0x65b   : > { %v3177_v25 = vpop.eup %3176  ;;  %2911 = vmatprep.subr.bf16.mxu1 %v1761_v60  ;;  %v1630_v61 = vpack.c.bf16 %v1617_v56, %v1616_v49  ;;  %v1620_v46 = vmul.f32 %v3175_v58, %v3853_v0 }
 0x65c   : > { %v3179_v52 = vpop.eup %3178  ;;  %2912 = vmatpush3.bf16.msra.mxu1 %v1761_v60  ;;  %v1622_v29 = vmul.f32 %v3177_v25, %v3836_v51 }
 0x65d   : > { %2905 = vmatprep.mubr.msk.bf16.mxu0 %vm984_vm2, %v1630_v61  ;;  %v1621_v59 = vmul.f32 %v3179_v52, %v3857_v50  ;;  %2925 = vmatprep.subr.bf16.mxu1 %v3104_v20 }
 0x65e   : > { %2906 = vmatmul.mubr.msk.bf16.vlgmr.msra.gmra.mrb[16].mxu0 %vm984_vm2, %v1631_v3  ;;  %v1633_v4 = vpack.c.bf16 %v1623_v2, %v1622_v29 }
 0x65f   : > { %2918 = vmatpush3.bf16.msra.mxu0 %v3873_v16  ;;  %v1632_v43 = vpack.c.bf16 %v1621_v59, %v1620_v46 }
 0x661   : > { %2913 = vmatprep.mubr.msk.bf16.mxu1 %vm984_vm2, %v1632_v43 }
 0x662   : > { %2914 = vmatmul.mubr.msk.bf16.vlgmr.msra.gmra.mrb[8].mxu1 %vm984_vm2, %v1633_v4 }
 0x663   : > { %2926 = vmatpush3.bf16.msra.mxu1 %v3104_v20 }
 0x664   : > { %2927 = vmatprep.subr.bf16.mxu1 %v3105_v34 }
 0x667   : > { %2928 = vmatpush3.bf16.msra.mxu1 %v3105_v34 }
 0x68d   : > { %v1595_v55 = vpop.xlane.xlu1 %1594 }
 0x68e   : > { %3180 = vrcp.f32 %v1595_v55 }
 0x68f   : > { %3182 = vrcp.f32 %v1586_v48 }
 0x690   : > { %3184 = vrcp.f32 %v1592_v11 }
 0x691   : > { %v1589_v6 = vpop.xlane.xlu1 %1588 }
 0x692   : > { %3186 = vrcp.f32 %v1589_v6 }
 0x695   : > { %v1822_v0 = vpop.permute.xlu1 %1821 }
 0x696   : > { %2919 = vmatprep.subr.bf16.mxu0 %v1822_v0 }
 0x697   : > { %2920 = vmatpush3.bf16.msra.mxu0 %v1822_v0 }
 0x698   : > { %v3181_v51 = vpop.eup %3180 }
 0x699   : > { %v3183_v50 = vpop.eup %3182  ;;  %v1627_v1 = vmul.f32 %v3181_v51, %v3876_v17 }
 0x69a   : > { %v3185_v10 = vpop.eup %3184  ;;  %v1624_v12 = vmul.f32 %v3183_v50, %v3865_v7 }
 0x69b   : > { %v1626_v13 = vmul.f32 %v3185_v10, %v3861_v5  ;;  %v2739_v10 = vld [vmem:[%s4158_s29] ss:$0 sm:$0xff] }
 0x69c   : > { %v3187_v31 = vpop.eup %3186 }
 0x69d   : > { %v1625_v62 = vmul.f32 %v3187_v31, %v3880_v30  ;;  %v1635_v16 = vpack.c.bf16 %v1627_v1, %v1626_v13 }
 0x69f   : > { %v1634_v14 = vpack.c.bf16 %v1625_v62, %v1624_v12 }
 0x6a1   : > { %2921 = vmatprep.mubr.msk.bf16.mxu0 %vm984_vm2, %v1634_v14 }
 0x6a2   : > { %2922 = vmatmul.mubr.msk.bf16.vlgmr.msra.gmra.mrb[20].mxu0 %vm984_vm2, %v1635_v16  ;;  %v3204_v16 = vld [vmem:[#allocation2] sm:$0xff] }
 0x710   : > { %v2899_v18 = vpop.f32.mrb[4].mxu1 }
 0x711   : > { %v1682_v27 = vpop.f32.mrb[5].mxu1 }
 0x712   : > { %v2900_v57 = vpop.f32.mrb[6].mxu1 }
 0x713   : > { %v1685_v19 = vpop.f32.mrb[7].mxu1 }
 0x731   : > { %v2907_v22 = vpop.f32.mrb[16].mxu0 }
 0x732   : > { %v1743_v23 = vpop.f32.mrb[17].mxu0 }
 0x733   : > { %v2908_v17 = vpop.f32.mrb[18].mxu0 }
 0x734   : > { %v3072_v7 = vpack.i.bf16 %v2908_v17, %v2907_v22  ;;  %v1746_v30 = vpop.f32.mrb[19].mxu0  ;;  %v3206_v22 = vld [vmem:[#allocation2 + $0x8] sm:$0xff] }
 0x735   : > { %v3082_v5 = vpack.i.bf16 %v1746_v30, %v1743_v23  ;;  %v2915_v33 = vpop.f32.mrb[8].mxu1  ;;  %v3207_v30 = vld [vmem:[#allocation2 + $0x18] sm:$0xff] }
 0x736   : > { %3073 = vrot.lane.b32.xlu1 %v3072_v7, %s3317_s22  ;;  %v1804_v35 = vpop.f32.mrb[9].mxu1 }
 0x737   : > { %3083 = vrot.lane.b32.xlu0 %v3082_v5, %s3317_s22  ;;  %v2916_v9 = vpop.f32.mrb[10].mxu1 }
 0x738   : > { %v3077_v37 = vpack.i.bf16 %v2916_v9, %v2915_v33  ;;  %v1807_v15 = vpop.f32.mrb[11].mxu1 }
 0x739   : > { %v3087_v39 = vpack.i.bf16 %v1807_v15, %v1804_v35 }
 0x73a   : > { %3078 = vrot.lane.b32.xlu1 %v3077_v37, %s3318_s16 }
 0x73b   : > { %3088 = vrot.lane.b32.xlu0 %v3087_v39, %s3318_s16  ;;  %s4162_s16 = sld [smem:[#allocation26_spill]] (!%p2760_p1) }
 0x775   : > { %v2923_v41 = vpop.f32.mrb[20].mxu0 }
 0x776   : > { %v1865_v21 = vpop.f32.mrb[21].mxu0 }
 0x777   : > { %v2924_v42 = vpop.f32.mrb[22].mxu0 }
 0x778   : > { %v3097_v24 = vpack.i.bf16 %v2924_v42, %v2923_v41  ;;  %v1868_v44 = vpop.f32.mrb[23].mxu0 }
 0x779   : > { %v3092_v45 = vpack.i.bf16 %v1868_v44, %v1865_v21 }
 0x77a   : > { %3098 = vrot.lane.b32.xlu1 %v3097_v24, %s3319_s18 }
 0x77b   : > { %3093 = vrot.lane.b32.xlu0 %v3092_v45, %s3319_s18 }
 0x7a8   : > { %v3074_v32 = vpop.permute.xlu1 %3073 }
 0x7a9   : > { %v3084_v63 = vpop.permute.xlu0 %3083  ;;  %v3076_v26 = vunpack.i.h.bf16 %v3074_v32  ;;  %v3075_v11 = vunpack.i.l.bf16 %v3074_v32 }
 0x7aa   : > { %v3086_v47 = vunpack.i.h.bf16 %v3084_v63  ;;  %v3085_v48 = vunpack.i.l.bf16 %v3084_v63 }
 0x7ab   : > { %v1931_v49 = vsel %vm1158_vm3, %v2900_v57, %v3076_v26  ;;  %v1930_v56 = vsel %vm1158_vm3, %v2899_v18, %v3075_v11  ;;  %v3205_v57 = vld [vmem:[#allocation2 + $0x10] sm:$0xff] }
 0x7ac   : > { %v3079_v8 = vpop.permute.xlu1 %3078  ;;  %v1929_v28 = vsel %vm1158_vm3, %v1685_v19, %v3086_v47  ;;  %v1928_v60 = vsel %vm1158_vm3, %v1682_v27, %v3085_v48 }
 0x7ad   : > { %v3089_v36 = vpop.permute.xlu0 %3088  ;;  %v3081_v38 = vunpack.i.h.bf16 %v3079_v8  ;;  %v3080_v53 = vunpack.i.l.bf16 %v3079_v8 }
 0x7ae   : > { %v3091_v40 = vunpack.i.h.bf16 %v3089_v36  ;;  %v3090_v54 = vunpack.i.l.bf16 %v3089_v36 }
 0x7af   : > { %v1935_v2 = vsel %vm1932_vm5, %v1930_v56, %v3080_v53  ;;  %v1936_v3 = vsel %vm1932_vm5, %v1931_v49, %v3081_v38  ;;  %v3106_v53 = vld [vmem:[%s3552_s28] sm:$0xff]  }
 0x7b0   : > { %v1934_v29 = vsel %vm1932_vm5, %v1929_v28, %v3091_v40  ;;  %v1933_v43 = vsel %vm1932_vm5, %v1928_v60, %v3090_v54  ;;  %2933 = vmatprep.subr.bf16.mxu0 %v3106_v53  ;;  %v3107_v40 = vld [vmem:[%s3552_s28 + $0x8] sm:$0xff]   ;;  %s4163_s28 = sld [smem:[#allocation24_spill]] (!%p2760_p1) }
 0x7b1   : > { %2934 = vmatpush3.bf16.msra.mxu0 %v3106_v53 }
 0x7b2   : > { %2935 = vmatprep.subr.bf16.mxu0 %v3107_v40 }
 0x7b5   : > { %2936 = vmatpush3.bf16.msra.mxu0 %v3107_v40 }
 0x7ec   : > { %v3099_v58 = vpop.permute.xlu1 %3098 }
 0x7ed   : > { %v3101_v25 = vunpack.i.h.bf16 %v3099_v58  ;;  %v3100_v61 = vunpack.i.l.bf16 %v3099_v58  ;;  %v3094_v52 = vpop.permute.xlu0 %3093 }
 0x7ee   : > { %v3096_v46 = vunpack.i.h.bf16 %v3094_v52  ;;  %v3095_v59 = vunpack.i.l.bf16 %v3094_v52 }
 0x7ef   : > { %v1940_v4 = vsel %vm1937_vm6, %v1935_v2, %v3100_v61  ;;  %v1941_v55 = vsel %vm1937_vm6, %v1936_v3, %v3101_v25 }
 0x7f0   : > { %v1943_v6 = vpack.c.bf16 %v1941_v55, %v1940_v4  ;;  %v1939_v0 = vsel %vm1937_vm6, %v1934_v29, %v3096_v46  ;;  %v1938_v51 = vsel %vm1937_vm6, %v1933_v43, %v3095_v59  ;;  %v2744_v29 = vld [vmem:[%s4159_s0] ss:$0 sm:$0xff] }
 0x7f1   : > { %v1942_v50 = vpack.c.bf16 %v1939_v0, %v1938_v51  ;;  %v2745_v51 = vld [vmem:[%s841_s19] ss:$0 sm:$0xff] }
 0x7f3   : > { %2929 = vmatprep.mubr.msk.bf16.mxu1 %vm984_vm2, %v1942_v50 }
 0x7f4   : > { %2930 = vmatmul.mubr.msk.bf16.vlgmr.msra.gmra.mrb[12].mxu1 %vm984_vm2, %v1943_v6 }
 0x8c7   : > { %v2931_v31 = vpop.f32.mrb[12].mxu1 }
 0x8c8   : > { %v2007_v1 = vpop.f32.mrb[13].mxu1  ;;  %v2016_v12 = vadd.f32 %v2931_v31, %v2739_v10 }
 0x8c9   : > { %v2008_v62 = vadd.f32 %v2739_v10, %v2007_v1  ;;  %v2932_v13 = vpop.f32.mrb[14].mxu1 }
 0x8ca   : > { %v2010_v14 = vpop.f32.mrb[15].mxu1  ;;  %v3934_v19 = vadd.f32 %v3205_v57, %v2016_v12  ;;  %v2019_v20 = vadd.f32 %v2932_v13, %v2739_v10 }
 0x8cb   : > { %v3932_v18 = vadd.f32 %v3204_v16, %v2008_v62  ;;  %v2011_v27 = vadd.f32 %v2739_v10, %v2010_v14 }
 0x8cc   : > { %v3942_v5 = vadd.f32 %v3207_v30, %v2019_v20  ;;  %v2034_v33 = vsel %vm984_vm2, %v3934_v19, 0.0  ;;  %v3111_v30 = vld [vmem:[%s3566_s1 + $0x18] sm:$0xff]  }
 0x8cd   : > { %v3936_v23 = vadd.f32 %v3206_v22, %v2011_v27  ;;  %v2028_v17 = vsel %vm984_vm2, %v3932_v18, 0.0  ;;  %v3108_v22 = vld [vmem:[%s3566_s1] sm:$0xff]  }
 0x8ce   : > { %2029 = vadd.xlane.f32.xlu0 %v2028_v17  ;;  %v2037_v35 = vsel %vm984_vm2, %v3942_v5, 0.0  ;;  %2941 = vmatprep.subr.bf16.mxu1 %v3108_v22  ;;  %v3109_v17 = vld [vmem:[%s3566_s1 + $0x8] sm:$0xff]  }
 0x8cf   : > { %v2031_v7 = vsel %vm984_vm2, %v3936_v23, 0.0  ;;  %2942 = vmatpush3.bf16.msra.mxu1 %v3108_v22 }
 0x8d0   : > { %2032 = vadd.xlane.f32.xlu1 %v2031_v7  ;;  %2943 = vmatprep.subr.bf16.mxu1 %v3109_v17  ;;  %v3110_v7 = vld [vmem:[%s3566_s1 + $0x10] sm:$0xff]  }
 0x8d2   : > { %2035 = vadd.xlane.f32.xlu0 %v2034_v33  ;;  %v3112_v33 = vld [vmem:[%s3566_s1 + $0x20] sm:$0xff]  }
 0x8d3   : > { %2944 = vmatpush3.bf16.msra.mxu1 %v3109_v17 }
 0x8d4   : > { %2945 = vmatprep.subr.bf16.mxu1 %v3110_v7 }
 0x8d6   : > { %2038 = vadd.xlane.f32.xlu0 %v2037_v35  ;;  %v3113_v35 = vld [vmem:[%s3566_s1 + $0x28] sm:$0xff]  }
 0x8d7   : > { %2946 = vmatpush3.bf16.msra.mxu1 %v3110_v7 }
 0x8d8   : > { %2947 = vmatprep.subr.bf16.mxu1 %v3111_v30 }
 0x8db   : > { %2948 = vmatpush3.bf16.msra.mxu1 %v3111_v30 }
 0x8dc   : > { %2949 = vmatprep.subr.bf16.mxu1 %v3112_v33 }
 0x8df   : > { %2950 = vmatpush3.bf16.msra.mxu1 %v3112_v33 }
 0x8e0   : > { %2951 = vmatprep.subr.bf16.mxu1 %v3113_v35 }
 0x8e3   : > { %2952 = vmatpush3.bf16.msra.mxu1 %v3113_v35 }
 0x95b   : > { %v2030_v9 = vpop.xlane.xlu0 %2029 }
 0x95c   : > { %v2040_v37 = vmul.f32 0.03125, %v2030_v9  ;;  %v3114_v9 = vld [vmem:[%s3566_s1 + $0x30] sm:$0xff]  }
 0x95d   : > { %v2033_v15 = vpop.xlane.xlu1 %2032  ;;  %2953 = vmatprep.subr.bf16.mxu1 %v3114_v9 }
 0x95e   : > { %v2044_v39 = vsub.f32 %v3932_v18, %v2040_v37  ;;  %v2041_v34 = vmul.f32 0.03125, %v2033_v15  ;;  %v3115_v37 = vld [vmem:[%s3566_s1 + $0x38] sm:$0xff]   ;;  %2954 = vmatpush3.bf16.msra.mxu1 %v3114_v9  ;;  %v2746_v15 = vld [vmem:[%s4160_s3] ss:$0 sm:$0xff] }
 0x95f   : > { %v2036_v41 = vpop.xlane.xlu0 %2035  ;;  %2955 = vmatprep.subr.bf16.mxu1 %v3115_v37 }
 0x960   : > { %v2045_v21 = vsub.f32 %v3936_v23, %v2041_v34  ;;  %v2042_v42 = vmul.f32 0.03125, %v2036_v41  ;;  %v2048_v24 = vmul.f32 %v2044_v39, %v2044_v39 }
 0x962   : > { %v2046_v44 = vsub.f32 %v3934_v19, %v2042_v42  ;;  %v2052_v45 = vsel %vm984_vm2, %v2048_v24, 0.0  ;;  %v2049_v32 = vmul.f32 %v2045_v21, %v2045_v21  ;;  %2956 = vmatpush3.bf16.msra.mxu1 %v3115_v37 }
 0x963   : > { %2053 = vadd.xlane.f32.xlu0 %v2052_v45  ;;  %v2039_v63 = vpop.xlane.xlu0 %2038 }
 0x964   : > { %v2043_v8 = vmul.f32 0.03125, %v2039_v63  ;;  %v2055_v26 = vsel %vm984_vm2, %v2049_v32, 0.0  ;;  %v2050_v11 = vmul.f32 %v2046_v44, %v2046_v44 }
 0x965   : > { %2056 = vadd.xlane.f32.xlu1 %v2055_v26 }
 0x966   : > { %v2047_v36 = vsub.f32 %v3942_v5, %v2043_v8  ;;  %v2058_v47 = vsel %vm984_vm2, %v2050_v11, 0.0 }
 0x967   : > { %2059 = vadd.xlane.f32.xlu0 %v2058_v47 }
 0x968   : > { %v2051_v48 = vmul.f32 %v2047_v36, %v2047_v36 }
 0x96a   : > { %v2061_v38 = vsel %vm984_vm2, %v2051_v48, 0.0 }
 0x96b   : > { %2062 = vadd.xlane.f32.xlu1 %v2061_v38 }
 0x9f0   : > { %v2054_v54 = vpop.xlane.xlu0 %2053 }
 0x9f1   : > { %v2064_v49 = vmul.f32 0.03125, %v2054_v54 }
 0x9f2   : > { %v2057_v56 = vpop.xlane.xlu1 %2056 }
 0x9f3   : > { %v2068_v58 = vadd.f32 1e-05, %v2064_v49  ;;  %v2065_v28 = vmul.f32 0.03125, %v2057_v56 }
 0x9f4   : > { %v2060_v60 = vpop.xlane.xlu0 %2059 }
 0x9f5   : > { %3188 = vrsqrt.f32 %v2068_v58  ;;  %v2069_v25 = vadd.f32 1e-05, %v2065_v28  ;;  %v2066_v61 = vmul.f32 0.03125, %v2060_v60 }
 0x9f7   : > { %3190 = vrsqrt.f32 %v2069_v25  ;;  %v2070_v52 = vadd.f32 1e-05, %v2066_v61 }
 0x9f8   : > { %v2063_v2 = vpop.xlane.xlu1 %2062 }
 0x9f9   : > { %3192 = vrsqrt.f32 %v2070_v52  ;;  %v2067_v3 = vmul.f32 0.03125, %v2063_v2 }
 0x9fb   : > { %v2071_v46 = vadd.f32 1e-05, %v2067_v3 }
 0x9fd   : > { %3194 = vrsqrt.f32 %v2071_v46 }
 0x9ff   : > { %v3189_v59 = vpop.eup %3188 }
 0xa00   : > { %v2076_v43 = vmul.f32 %v3189_v59, %v2044_v39 }
 0xa01   : > { %v3191_v4 = vpop.eup %3190 }
 0xa02   : > { %v2077_v55 = vmul.f32 %v3191_v4, %v2045_v21  ;;  %v2086_v6 = vmul.f32 %v2744_v29, %v2076_v43 }
 0xa03   : > { %v3193_v0 = vpop.eup %3192 }
 0xa04   : > { %v2078_v50 = vmul.f32 %v3193_v0, %v2046_v44  ;;  %v2087_v10 = vmul.f32 %v2744_v29, %v2077_v55  ;;  %v2096_v31 = vadd.f32 %v2745_v51, %v2086_v6 }
 0xa06   : > { %v2097_v1 = vadd.f32 %v2745_v51, %v2087_v10  ;;  %v2088_v62 = vmul.f32 %v2744_v29, %v2078_v50 }
 0xa07   : > { %v3195_v12 = vpop.eup %3194 }
 0xa08   : > { %v2079_v13 = vmul.f32 %v3195_v12, %v2047_v36  ;;  %v2100_v14 = vpack.c.bf16 %v2097_v1, %v2096_v31  ;;  %v2098_v27 = vadd.f32 %v2745_v51, %v2088_v62 }
 0xa0a   : > { %v2089_v16 = vmul.f32 %v2744_v29, %v2079_v13  ;;  %2937 = vmatprep.mubr.msk.bf16.mxu0 %vm984_vm2, %v2100_v14  ;;  %v2751_v14 = vld [vmem:[%s857_s21] ss:$0 sm:$0xff]  ;;  %s4166_s21 = sld [smem:[#allocation27_spill]] (!%p2760_p1) }
 0xa0c   : > { %v2099_v57 = vadd.f32 %v2745_v51, %v2089_v16 }
 0xa0e   : > { %v2101_v20 = vpack.c.bf16 %v2099_v57, %v2098_v27 }
 0xa10   : > { %2938 = vmatmul.mubr.msk.bf16.vlgmr.msra.gmra.mrb[24].mxu0 %vm984_vm2, %v2101_v20 }
 0xae3   : > { %v2939_v39 = vpop.f32.mrb[24].mxu0 }
 0xae4   : > { %v2174_v34 = vadd.f32 %v2939_v39, %v2746_v15  ;;  %v2165_v41 = vpop.f32.mrb[25].mxu0 }
 0xae5   : > { %v2166_v21 = vadd.f32 %v2746_v15, %v2165_v41  ;;  %v2940_v42 = vpop.f32.mrb[26].mxu0 }
 0xae6   : > { %v2186_v24 = vmul.f32 0.044715, %v2174_v34  ;;  %v2177_v44 = vadd.f32 %v2940_v42, %v2746_v15  ;;  %v2168_v45 = vpop.f32.mrb[27].mxu0  ;;  %v2182_v4 = vmul.f32 0.5, %v2174_v34 }
 0xae7   : > { %v2184_v32 = vmul.f32 0.044715, %v2166_v21  ;;  %v2169_v63 = vadd.f32 %v2746_v15, %v2168_v45  ;;  %v2180_v0 = vmul.f32 0.5, %v2166_v21 }
 0xae8   : > { %v2190_v8 = vmul.f32 %v2186_v24, %v2174_v34  ;;  %v2187_v26 = vmul.f32 0.044715, %v2177_v44  ;;  %v2183_v55 = vmul.f32 0.5, %v2177_v44 }
 0xae9   : > { %v2188_v11 = vmul.f32 %v2184_v32, %v2166_v21  ;;  %v2185_v36 = vmul.f32 0.044715, %v2169_v63  ;;  %v2181_v51 = vmul.f32 0.5, %v2169_v63  ;;  %v2350_v32 = vld [vmem:[%s4163_s28] sm:$0x1] (!%p2760_p1) }
 0xaea   : > { %v2194_v47 = vmul.f32 %v2190_v8, %v2174_v34  ;;  %v2191_v48 = vmul.f32 %v2187_v26, %v2177_v44  ;;  %v2351_v8 = vld [vmem:[%s4164_s30] sm:$0x1] (!%p2760_p1) }
 0xaeb   : > { %v2192_v38 = vmul.f32 %v2188_v11, %v2166_v21  ;;  %v2189_v53 = vmul.f32 %v2185_v36, %v2169_v63 }
 0xaec   : > { %v2198_v40 = vadd.f32 %v2194_v47, %v2174_v34  ;;  %v2195_v54 = vmul.f32 %v2191_v48, %v2177_v44  ;;  %v3210_v47 = vld [vmem:[%s4165_s5] sm:$0xff] (!%p2760_p1)   ;;  %v3211_v48 = vld [vmem:[%s4165_s5 + $0x8] sm:$0xff] (!%p2760_p1)  }
 0xaed   : > { %v2193_v49 = vmul.f32 %v2189_v53, %v2169_v63  ;;  %v2196_v56 = vadd.f32 %v2192_v38, %v2166_v21  ;;  %v3209_v21 = vld [vmem:[%s4162_s16 + $0x8] sm:$0xff] (!%p2760_p1)   ;;  %v2373_v38 = vld [vmem:[%s4166_s21] sm:$0x1] (!%p2760_p1) }
 0xaee   : > { %v2202_v58 = vmul.f32 0.7978846, %v2198_v40  ;;  %v2199_v28 = vadd.f32 %v2195_v54, %v2177_v44 }
 0xaef   : > { %v2197_v60 = vadd.f32 %v2193_v49, %v2169_v63  ;;  %v2200_v25 = vmul.f32 0.7978846, %v2196_v56 }
 0xaf0   : > { %3196 = vtanh.f32 %v2202_v58  ;;  %v2203_v61 = vmul.f32 0.7978846, %v2199_v28 }
 0xaf1   : > { %v2201_v52 = vmul.f32 0.7978846, %v2197_v60  ;;  %3198 = vtanh.f32 %v2200_v25  ;;  %v2435_v60 = vld [vmem:[%s4167_s4] sm:$0x1] (!%p2760_p1) }
 0xaf2   : > { %3200 = vtanh.f32 %v2203_v61 }
 0xaf3   : > { %3202 = vtanh.f32 %v2201_v52 }
 0xafa   : > { %v3197_v2 = vpop.eup %3196 }
 0xafb   : > { %v3199_v3 = vpop.eup %3198  ;;  %v2210_v46 = vadd.f32 1.0, %v3197_v2 }
 0xafc   : > { %v3201_v59 = vpop.eup %3200  ;;  %v2208_v29 = vadd.f32 1.0, %v3199_v3 }
 0xafd   : > { %v3203_v43 = vpop.eup %3202  ;;  %v2211_v6 = vadd.f32 1.0, %v3201_v59  ;;  %v2214_v10 = vmul.f32 %v2210_v46, %v2182_v4 }
 0xafe   : > { %v2209_v50 = vadd.f32 1.0, %v3203_v43  ;;  %v2212_v1 = vmul.f32 %v2208_v29, %v2180_v0 }
 0xaff   : > { %v2215_v31 = vmul.f32 %v2211_v6, %v2183_v55 }
 0xb00   : > { %v2213_v12 = vmul.f32 %v2209_v50, %v2181_v51 }
 0xb01   : > { %v2217_v62 = vpack.c.bf16 %v2215_v31, %v2214_v10 }
 0xb02   : > { %v2216_v13 = vpack.c.bf16 %v2213_v12, %v2212_v1 }
 0xb04   : > { %2957 = vmatprep.mubr.bf16.mxu1 %v2216_v13 }
 0xb05   : > { %2958 = vmatmul.mubr.bf16.vlgmr.msra.gmra.mrb[16].mxu1 %v2217_v62 }
 0xbd8   : > { %v2959_v16 = vpop.f32.mrb[16].mxu1 }
 0xbd9   : > { %v2332_v27 = vadd.f32 %v2959_v16, %v2751_v14  ;;  %v2323_v57 = vpop.f32.mrb[17].mxu1 }
 0xbda   : > { %v2324_v20 = vadd.f32 %v2751_v14, %v2323_v57  ;;  %v2960_v22 = vpop.f32.mrb[18].mxu1  ;;  %2349 = sbr.rel (%p2760_p1) target bundleno = 3795 (0xed3), region = 112 }
 0xbdb   : > { %v2340_v17 = vadd.f32 %v2332_v27, %v3934_v19  ;;  %v2335_v7 = vadd.f32 %v2960_v22, %v2751_v14  ;;  %v2326_v30 = vpop.f32.mrb[19].mxu1 }
 0xbdc   : > { %v2338_v33 = vadd.f32 %v2324_v20, %v3932_v18  ;;  %v2327_v35 = vadd.f32 %v2751_v14, %v2326_v30 }
 0xbdd   : > { %2344 = vst.msk [vmem:[#allocation2 + $0x10] sm:$0xff] %vm984_vm2, %v2340_v17  ;;  %v2341_v9 = vadd.f32 %v2335_v7, %v3942_v5  ;;  %v3320_v5 = vmov (!%p2760_p1), 0.0  }
 0xbde   : > { %2342 = vst.msk [vmem:[#allocation2] sm:$0xff] %vm984_vm2, %v2338_v33  ;;  %v2339_v37 = vadd.f32 %v2327_v35, %v3936_v23  ;;  %v2353_v19 = vsel (!%p2760_p1), %vm2352_vm7, %v2338_v33, 0.0  ;;  %v3208_v23 = vld [vmem:[%s4162_s16] sm:$0xff] (!%p2760_p1)   ;;  %2961 = vmatprep.subr.bf16.mxu0 (!%p2760_p1), %v3320_v5  ;;  %2965 = vmatprep.mubr.msk.bf16.mxu0 (!%p2760_p1), %vm3321_vm8, %v3320_v5 }
 0xbdf   : > { %2345 = vst.msk [vmem:[#allocation2 + $0x18] sm:$0xff] %vm984_vm2, %v2341_v9  ;;  %2354 = vadd.xlane.f32.xlu0 (!%p2760_p1), %v2353_v19  ;;  %2962 = vmatpush3.bf16.msra.mxu0 (!%p2760_p1), %v3208_v23 }
 0xbe0   : > { %2343 = vst.msk [vmem:[#allocation2 + $0x8] sm:$0xff] %vm984_vm2, %v2339_v37  ;;  %2969 = vmatprep.subr.bf16.mxu1 (!%p2760_p1), %v3320_v5  ;;  %2963 = vmatprep.subr.bf16.mxu0 (!%p2760_p1), %v3320_v5 }
 0xbe1   : > { %2973 = vmatprep.mubr.msk.bf16.mxu1 %vm3321_vm8, %v3320_v5  ;;  %2970 = vmatpush3.bf16.msra.mxu1 %v3210_v47 }
 0xbe2   : > { %2971 = vmatprep.subr.bf16.mxu1 %v3320_v5 }
 0xbe3   : > { %2964 = vmatpush3.bf16.msra.mxu0 %v3209_v21 }
 0xbe5   : > { %2972 = vmatpush3.bf16.msra.mxu1 %v3211_v48 }
 0xc6c   : > { %v2355_v18 = vpop.xlane.xlu0 %2354 }
 0xc6d   : > { %v2356_v15 = vmul.f32 0.03125, %v2355_v18 }
 0xc6f   : > { %v2357_v39 = vsub.f32 %v2338_v33, %v2356_v15 }
 0xc71   : > { %v2358_v34 = vmul.f32 %v2357_v39, %v2357_v39 }
 0xc73   : > { %v2359_v41 = vsel %vm2352_vm7, %v2358_v34, 0.0 }
 0xc74   : > { %2360 = vadd.xlane.f32.xlu0 %v2359_v41 }
 0xd01   : > { %v2361_v42 = vpop.xlane.xlu0 %2360 }
 0xd02   : > { %v2362_v24 = vmul.f32 0.03125, %v2361_v42 }
 0xd04   : > { %v2363_v44 = vadd.f32 1e-05, %v2362_v24 }
 0xd06   : > { %3212 = vrsqrt.f32 %v2363_v44 }
 0xd10   : > { %v3213_v45 = vpop.eup %3212 }
 0xd11   : > { %v2365_v63 = vmul.f32 %v3213_v45, %v2357_v39 }
 0xd13   : > { %v2366_v26 = vmul.f32 %v2365_v63, %v2350_v32 }
 0xd15   : > { %v2367_v11 = vadd.f32 %v2366_v26, %v2351_v8 }
 0xd17   : > { %v2368_v36 = vpack.c.bf16 %v2367_v11, %v2367_v11 }
 0xd19   : > { %2966 = vmatmul.mubr.msk.bf16.vlgmr.msra.gmra.mrb[0].mxu0 %vm984_vm2, %v2368_v36 }
 0xdec   : > { %v2423_v53 = vpop.f32.mrb[0].mxu0 }
 0xded   : > { %v2424_v40 = vadd.f32 %v2423_v53, %v2373_v38  ;;  %v2967_v54 = vpop.f32.mrb[1].mxu0 }
 0xdee   : > { %v2426_v49 = vpop.f32.mrb[2].mxu0 }
 0xdef   : > { %3214 = vtanh.f32 %v2424_v40  ;;  %v2968_v56 = vpop.f32.mrb[3].mxu0 }
 0xdf9   : > { %v3215_v58 = vpop.eup %3214 }
 0xdfa   : > { %v2430_v28 = vpack.c.bf16 %v3215_v58, %v3215_v58 }
 0xdfc   : > { %2974 = vmatmul.mubr.msk.bf16.vlgmr.msra.gmra.mrb[0].mxu1 %vm984_vm2, %v2430_v28 }
 0xecf   : > { %v2485_v25 = vpop.f32.mrb[0].mxu1 }
 0xed0   : > { %v2486_v61 = vadd.f32 %v2485_v25, %v2435_v60  ;;  %v2975_v52 = vpop.f32.mrb[1].mxu1 }
 0xed1   : > { %v2488_v2 = vpop.f32.mrb[2].mxu1 }
 0xed2   : > { %2492 = vst.msk [vmem:[%s3570_s15] sm:$0x1] %vm2491_vm9, %v2486_v61  ;;  %v2976_v3 = vpop.f32.mrb[3].mxu1 }
 0xed3 PF: > { %s4168_s27 = sld [smem:[#allocation9_spill]]  ;;  %s4170_s30 = sld [smem:[#allocation30_spill]] }
 0xed4   : > { %s2506_s19 = sshll.u32 %s3570_s15, 4  ;;  %s4171_s3 = sand.u32 1, %s3286_s25   ;;  %s2507_s19 = int_to_ptr.vmem [resolvable:$true] %s2506_s19 }
 0xed5   : > { %s2494_s1 = scalar_lea.sflag [#allocation4], %s4171_s3  ;;  %s3216_s23 = scalar_lea.vmem %s2507_s19, 16 }
 0xed6   : > { %p3217_p2 = scmp.ne.s32.totalorder %s2507_s19, %s3216_s23  ;;  %s3322_s2 = smov [#allocation3]  }
 0xed7   : > { %s3220_s21 = sshll.u32 %s3322_s2, 4  ;;  %s3221_s21 = int_to_ptr.vmem [resolvable:$false] %s3220_s21 }
 0xed8   : > { %p3218_p4 = pnand %p3217_p2, %p3482_p3  ;;  %s3222_s22 = scalar_lea.vmem %s3221_s21, 32 }
 0xed9   : > { %s2767_s28 = sshll.u32 %s4168_s27, 4  ;;  %p3223_p6 = scmp.lt.s32.totalorder %s2507_s19, %s3221_s21 }
 0xeda   : > { %s4028_s17 = scalar_lea.hbm %s4170_s30, %s2767_s28  ;;  %p3219_p5 = pneg %p3218_p4 }
 0xedb   : > { %p3224_p7 = scmp.lt.s32.totalorder %s3222_s22, %s3216_s23 }
 0xedd   : > { %p3225_p8 = por %p3224_p7, %p3223_p6 }
 0xedf   : > { %p3226_p10 = pnand %p3225_p8, %p3219_p5 }
 0xee1   : > { %3229 = shalt.err (!%p3226_p10)
}
 0xee2   : > { %s3230_s15 = scalar_lea.hbm %s4028_s17, 16  ;;  %s3234_s27 = scalar_lea.hbm %s4170_s30, 32 }
 0xee3   : > { %p3231_p11 = scmp.ne.s32.totalorder %s4028_s17, %s3230_s15  ;;  %p3235_p0 = scmp.lt.u32.totalorder %s4028_s17, %s4170_s30 }
 0xee4   : > { %p3236_p1 = scmp.lt.u32.totalorder %s3234_s27, %s3230_s15  ;;  %p3238_p4 = scmp.lt.u32.totalorder %s3230_s15, %s4028_s17 }
 0xee5   : > { %p3232_p12 = pnand %p3231_p11, %p3482_p3 }
 0xee6   : > { %p3237_p2 = por %p3236_p1, %p3235_p0 }
 0xee7   : > { %p3233_p13 = pneg %p3232_p12 }
 0xee8   : > { %p3239_p5 = por %p3238_p4, %p3237_p2 }
 0xeea   : > { %p3240_p6 = pnand %p3239_p5, %p3233_p13 }
 0xeec   : > { %3243 = shalt.err (!%p3240_p6)
}
 0xeed   : > { %2985 = dma.vmem_to_hbm [thread:$0]  (%p3482_p3), %s2507_s19, 16, %s4028_s17, %s2494_s1  }
 0xeee PF: > { %s4172_s0 = sld [smem:[#allocation12_spill]]  ;;  %s4173_s3 = sld [smem:[#allocation6_spill]] }
 0xef4   : > { %p2991_p7 = scmp.ge.s32.totalorder %s4172_s0, 2  ;;  %s2518_s2 = sand.u32 1, %s4173_s3  }
 0xef5   : > { %s2519_s21 = scalar_lea.sflag [#allocation4], %s2518_s2 }
 0xef6   : > { %p2988_p8 = pnand %p2991_p7, %p3492_p9 }
 0xef8   : > { %3277 = dma.done.wait (!%p2988_p8), %s2519_s21, 16  }
 0xef9   : > { %3279 = vsyncadd (!%p2988_p8), %s2519_s21, 4294967280  ;;  %s34_s0 = sadd.s32 1, %s4172_s0   ;;  %s4175_s22 = sld [smem:[#allocation7_spill]] }
 0xefa   : > { %p31_p10 = scmp.ge.s32.totalorder %s34_s0, 6   ;;  %s4176_s26 = sld [smem:[#allocation17_spill]] }
 0xefb   : > { %s4177_s27 = sld [smem:[#allocation10_spill]]  ;;  %s4178_s3 = sld [smem:[#allocation11_spill]] }
 0xefc   : > { %s4179_s28 = sld [smem:[#allocation13_spill]]  ;;  %s4180_s29 = sld [smem:[#allocation15_spill]] }
 0xefd   : > { %s4181_s2 = smov %s3286_s25  ;;  %33 = sbr.rel (!%p31_p10) target bundleno = 19 (0x13), region = 183 }
 0xeff   : > { %s4182_s25 = smov %s4175_s22 }
 0xf04   :  { %2523 = vsyncpa [#allocation4], 1 }
 0xf05   :  { %2525 = vsyncpa [#allocation4 + $0x1], 1 }

</bundles_post_ra>
